<compile_context>
chip_gen: v7x
topology: tpu7x:2x2x1
jax: 0.10.0
libtpu: 0.0.40
codegen_flags: <defaults>
</compile_context>

<pallas_src>
import jax
import jax.numpy as jnp
from jax.experimental import pallas as pl
from jax.experimental.pallas import tpu as pltpu


def _fused_kernel(x_ref, r_ref, w1s_ref, bias_ref, w2_ref, out_ref):
    # One C2 tile of: w2_tile @ relu(r + (w1*scale) @ x + bias)
    #   x_ref:    [Cin, P]  bf16  stride-2-subsampled x405 (channel-major)
    #   r_ref:    [Cin, P]  f32   stride-2-subsampled residual x393
    #   w1s_ref:  [C1, Cin] bf16  conv2d128 weight with BN scale folded in
    #   bias_ref: [C1, 1]   f32   folded BN bias
    #   w2_ref:   [TC2, C1] bf16  conv2d129 weight tile
    #   out_ref:  [TC2, P]  f32
    y = jnp.dot(w1s_ref[...], x_ref[...], preferred_element_type=jnp.float32)
    z = jnp.maximum(r_ref[...] + y + bias_ref[...], 0.0)          # BN bias + add + relu
    out_ref[...] = jnp.dot(w2_ref[...], z.astype(jnp.bfloat16),
                           preferred_element_type=jnp.float32)


def prepare_params(w1, gamma, beta, run_mean, run_var, w2, eps=1e-5):
    """One-time weight prep (weights are static in inference): BN fold + bf16 cast."""
    C1 = w1.shape[0]
    scale = gamma * jax.lax.rsqrt(run_var + eps)                      # [C1]
    bias = (beta - run_mean * scale).reshape(C1, 1).astype(jnp.float32)
    w1s_bf = (w1[:, :, 0, 0] * scale[:, None]).astype(jnp.bfloat16)   # [C1, Cin]
    w2_bf = w2[:, :, 0, 0].astype(jnp.bfloat16)                       # [C2, C1]
    return w1s_bf, bias, w2_bf


def _pick_c2_tile(c2):
    for t in (296, 224, 128, 112, 64, 32, 16, 8):
        if c2 % t == 0:
            return t
    return c2


@jax.jit
def fused_forward(x405, x393, w1s_bf, bias, w2_bf):
    N, C, H, W = x405.shape
    C1 = w1s_bf.shape[0]
    C2 = w2_bf.shape[0]
    Ho, Wo = (H - 1) // 2 + 1, (W - 1) // 2 + 1
    P = Ho * Wo

    # Hoisted stride-2 subsample (fused with the bf16 cast inside this jit).
    if N == 1:
        x_cm = x405[0, :, ::2, ::2].reshape(C, P)        # [Cin, P] channel-major
        r_cm = x393[0, :, ::2, ::2].reshape(C, P)
        PT = P
    else:
        # TODO(synk): generic-batch path pays one NCHW -> [C, N*P] transpose.
        x_cm = jnp.transpose(x405[:, :, ::2, ::2], (1, 0, 2, 3)).reshape(C, N * P)
        r_cm = jnp.transpose(x393[:, :, ::2, ::2], (1, 0, 2, 3)).reshape(C, N * P)
        PT = N * P

    x_bf = x_cm.astype(jnp.bfloat16)
    r_f32 = r_cm.astype(jnp.float32)

    tc2 = _pick_c2_tile(C2)
    grid = (C2 // tc2,)

    flops = grid[0] * 2 * PT * C * C1 + 2 * PT * C1 * C2
    bytes_accessed = (x_bf.size * 2 + r_f32.size * 4 + w1s_bf.size * 2
                      + bias.size * 4 + w2_bf.size * 2 + C2 * PT * 4)

    out_flat = pl.pallas_call(
        _fused_kernel,
        out_shape=jax.ShapeDtypeStruct((C2, PT), jnp.float32),
        grid_spec=pltpu.PrefetchScalarGridSpec(
            num_scalar_prefetch=0,
            grid=grid,
            in_specs=[
                pl.BlockSpec((C, PT), lambda i: (0, 0)),    # x   (resident)
                pl.BlockSpec((C, PT), lambda i: (0, 0)),    # r   (resident)
                pl.BlockSpec((C1, C), lambda i: (0, 0)),    # w1s (resident)
                pl.BlockSpec((C1, 1), lambda i: (0, 0)),    # bias(resident)
                pl.BlockSpec((tc2, C1), lambda i: (i, 0)),  # w2  (pipelined over C2)
            ],
            out_specs=pl.BlockSpec((tc2, PT), lambda i: (i, 0)),
        ),
        compiler_params=pltpu.CompilerParams(
            dimension_semantics=("parallel",)),
        cost_estimate=pl.CostEstimate(flops=flops, transcendentals=0,
                                      bytes_accessed=bytes_accessed),
    )(x_bf, r_f32, w1s_bf, bias, w2_bf)

    if N == 1:
        return out_flat.reshape(1, C2, Ho, Wo)
    return jnp.transpose(out_flat.reshape(C2, N, Ho, Wo), (1, 0, 2, 3))


def _reference(x405, x393, w1, gamma, beta, run_mean, run_var, w2, eps=1e-5):
    # Pure-JAX f32 reference mirroring the torch forward (eval-mode BN).
    hp = jax.lax.Precision.HIGHEST
    x = jnp.transpose(x405, (0, 2, 3, 1))
    r = jnp.transpose(x393, (0, 2, 3, 1))
    y = jnp.einsum('nhwc,oc->nhwo', x, w1[:, :, 0, 0], precision=hp)
    scale = gamma / jnp.sqrt(run_var + eps)
    y = y * scale + (beta - run_mean * scale)
    z = jnp.maximum(r + y, 0.0)
    z = z[:, ::2, ::2, :]
    out = jnp.einsum('nhwc,oc->nhwo', z, w2[:, :, 0, 0], precision=hp)
    return jnp.transpose(out, (0, 3, 1, 2))


if __name__ == "__main__":
    key = jax.random.PRNGKey(0)
    k = jax.random.split(key, 8)

    N, C, H, W = 1, 336, 14, 14
    C2 = 888

    x405 = jax.random.normal(k[0], (N, C, H, W), dtype=jnp.float32)
    x393 = jax.random.normal(k[1], (N, C, H, W), dtype=jnp.float32)

    # deterministic synthetic parameters (shapes from the module __init__)
    w1 = jax.random.normal(k[2], (C, C, 1, 1), dtype=jnp.float32) * 0.05
    w2 = jax.random.normal(k[3], (C2, C, 1, 1), dtype=jnp.float32) * 0.05
    gamma = 1.0 + 0.1 * jax.random.normal(k[4], (C,), dtype=jnp.float32)
    beta = 0.1 * jax.random.normal(k[5], (C,), dtype=jnp.float32)
    run_mean = 0.1 * jax.random.normal(k[6], (C,), dtype=jnp.float32)
    run_var = jnp.abs(jax.random.normal(k[7], (C,), dtype=jnp.float32)) + 0.5

    # One-time weight preparation (hoisted out of the hot path).
    w1s_bf, bias, w2_bf = prepare_params(w1, gamma, beta, run_mean, run_var, w2)
    w1s_bf, bias, w2_bf = jax.block_until_ready((w1s_bf, bias, w2_bf))

    out = fused_forward(x405, x393, w1s_bf, bias, w2_bf)
    out = jax.block_until_ready(out)
    Ho, Wo = (H - 1) // 2 + 1, (W - 1) // 2 + 1
    assert out.shape == (N, C2, Ho, Wo)

    # Relative-error check (bf16 MXU inputs vs f32 reference).
    ref = _reference(x405, x393, w1, gamma, beta, run_mean, run_var, w2)
    max_abs = float(jnp.max(jnp.abs(out - ref)))
    ref_max = float(jnp.max(jnp.abs(ref)))
    assert max_abs <= 2.5e-2 * ref_max + 1e-3, (
        f"max abs err {max_abs} too large (ref max {ref_max})")
    print("KERNEL_OK")
</pallas_src>

<mosaic_0001>
module attributes {stable_mosaic.version = 11 : i64} {
  func.func @_fused_kernel(%arg0: i32, %arg1: memref<336x49xbf16, #tpu.memory_space<vmem>>, %arg2: memref<336x49xf32, #tpu.memory_space<vmem>>, %arg3: memref<336x336xbf16, #tpu.memory_space<vmem>>, %arg4: memref<336x1xf32, #tpu.memory_space<vmem>>, %arg5: memref<296x336xbf16, #tpu.memory_space<vmem>>, %arg6: memref<296x49xf32, #tpu.memory_space<vmem>>) attributes {dimension_semantics = [#tpu.dimension_semantics<parallel>], iteration_bounds = array<i64: 3>, scalar_prefetch = 0 : i64, scratch_operands = 0 : i64, tpu.core_type = #tpu.core_type<tc>, window_params = [{pipeline_mode = #tpu.pipeline_mode<synchronous>, transform_indices = @transform_0, window_bounds = array<i64: 336, 49>}, {pipeline_mode = #tpu.pipeline_mode<synchronous>, transform_indices = @transform_1, window_bounds = array<i64: 336, 49>}, {pipeline_mode = #tpu.pipeline_mode<synchronous>, transform_indices = @transform_2, window_bounds = array<i64: 336, 336>}, {pipeline_mode = #tpu.pipeline_mode<synchronous>, transform_indices = @transform_3, window_bounds = array<i64: 336, 1>}, {transform_indices = @transform_4, window_bounds = array<i64: 296, 336>}, {transform_indices = @transform_5, window_bounds = array<i64: 296, 49>}]} {
    %c0 = arith.constant 0 : index
    %c0_0 = arith.constant 0 : index
    %0 = vector.load %arg3[%c0, %c0_0] : memref<336x336xbf16, #tpu.memory_space<vmem>>, vector<336x336xbf16>
    %c0_1 = arith.constant 0 : index
    %c0_2 = arith.constant 0 : index
    %1 = vector.load %arg1[%c0_1, %c0_2] : memref<336x49xbf16, #tpu.memory_space<vmem>>, vector<336x49xbf16>
    %cst = arith.constant dense<0.000000e+00> : vector<336x49xf32>
    %2 = tpu.matmul %0, %1, %cst {dimension_numbers = #tpu.dot_dimension_numbers<[1], [0], [0], [1], [0, 0, 1, 1], [], []>} : vector<336x336xbf16>, vector<336x49xbf16>, vector<336x49xf32> -> vector<336x49xf32>
    %c0_3 = arith.constant 0 : index
    %c0_4 = arith.constant 0 : index
    %3 = vector.load %arg2[%c0_3, %c0_4] : memref<336x49xf32, #tpu.memory_space<vmem>>, vector<336x49xf32>
    %4 = arith.addf %3, %2 : vector<336x49xf32>
    %c0_5 = arith.constant 0 : index
    %c0_6 = arith.constant 0 : index
    %5 = vector.load %arg4[%c0_5, %c0_6] : memref<336x1xf32, #tpu.memory_space<vmem>>, vector<336x1xf32>
    %6 = vector.broadcast %5 : vector<336x1xf32> to vector<336x49xf32>
    %7 = arith.addf %4, %6 : vector<336x49xf32>
    %cst_7 = arith.constant 0.000000e+00 : f32
    %8 = vector.broadcast %cst_7 : f32 to vector<336x49xf32>
    %9 = arith.maximumf %7, %8 : vector<336x49xf32>
    %c0_8 = arith.constant 0 : index
    %c0_9 = arith.constant 0 : index
    %10 = vector.load %arg5[%c0_8, %c0_9] : memref<296x336xbf16, #tpu.memory_space<vmem>>, vector<296x336xbf16>
    %11 = arith.truncf %9 : vector<336x49xf32> to vector<336x49xbf16>
    %cst_10 = arith.constant dense<0.000000e+00> : vector<296x49xf32>
    %12 = tpu.matmul %10, %11, %cst_10 {dimension_numbers = #tpu.dot_dimension_numbers<[1], [0], [0], [1], [0, 0, 1, 1], [], []>} : vector<296x336xbf16>, vector<336x49xbf16>, vector<296x49xf32> -> vector<296x49xf32>
    %c0_11 = arith.constant 0 : index
    %c0_12 = arith.constant 0 : index
    %13 = vector.load %arg6[%c0_11, %c0_12] : memref<296x49xf32, #tpu.memory_space<vmem>>, vector<296x49xf32>
    tpu.vector_store %arg6[%c0_11, %c0_12], %12 {strides = array<i32>} : memref<296x49xf32, #tpu.memory_space<vmem>>, vector<296x49xf32>,
    return
  }
  func.func @transform_0(%arg0: i32) -> (i32, i32) {
    %c0_i32 = arith.constant 0 : i32
    %c0_i32_0 = arith.constant 0 : i32
    %c0_i32_1 = arith.constant 0 : i32
    return %c0_i32, %c0_i32_0 : i32, i32
  }
  func.func @transform_1(%arg0: i32) -> (i32, i32) {
    %c0_i32 = arith.constant 0 : i32
    %c0_i32_0 = arith.constant 0 : i32
    %c0_i32_1 = arith.constant 0 : i32
    return %c0_i32, %c0_i32_0 : i32, i32
  }
  func.func @transform_2(%arg0: i32) -> (i32, i32) {
    %c0_i32 = arith.constant 0 : i32
    %c0_i32_0 = arith.constant 0 : i32
    %c0_i32_1 = arith.constant 0 : i32
    return %c0_i32, %c0_i32_0 : i32, i32
  }
  func.func @transform_3(%arg0: i32) -> (i32, i32) {
    %c0_i32 = arith.constant 0 : i32
    %c0_i32_0 = arith.constant 0 : i32
    %c0_i32_1 = arith.constant 0 : i32
    return %c0_i32, %c0_i32_0 : i32, i32
  }
  func.func @transform_4(%arg0: i32) -> (i32, i32) {
    %c0_i32 = arith.constant 0 : i32
    %c0_i32_0 = arith.constant 0 : i32
    return %arg0, %c0_i32 : i32, i32
  }
  func.func @transform_5(%arg0: i32) -> (i32, i32) {
    %c0_i32 = arith.constant 0 : i32
    %c0_i32_0 = arith.constant 0 : i32
    return %arg0, %c0_i32 : i32, i32
  }
}

</mosaic_0001>

<bundles_post_ra>
// kernel: squeeze.3
= control target key start
LH: loop header
LB: loop body
LE: loop exit
PB: predicated region body
PF: predicated region fallthrough
CT: control target
= control target key end

     0   :  { %vm4_vm0 = vcmask 654336   ;;  %s388_s0 = inlined_call_operand.vmem [shape: f32[336,7,7], index: 0, kind: input, shape index: {}]   ;;  %s389_s1 = inlined_call_operand.vmem [shape: f32[336,49], index: 1, kind: output, shape index: {}]  }
   0x1   :  { %v127_v0 = vld [vmem:[%s388_s0 + $0x10] sm:$0x7f]   ;;  %v129_v1 = vld [vmem:[%s388_s0 + $0x28] sm:$0x7f]   ;;  %v132_v2 = vld [vmem:[%s388_s0 + $0x40] sm:$0x7f]  }
   0x2   :  { %128 = vst.msk [vmem:[%s389_s1 + $0x10] sm:$0x7f] %vm4_vm0, %v127_v0   ;;  %130 = vst.msk [vmem:[%s389_s1 + $0x17] ss:$17 sm:$0x3] %vm4_vm0, %v129_v1  }
   0x3   :  { %131 = vst.msk [vmem:[%s389_s1 + $0x27] sm:$0x7c] %vm4_vm0, %v129_v1   ;;  %133 = vst.msk [vmem:[%s389_s1 + $0x2e] sm:$0x3] %vm4_vm0, %v132_v2   ;;  %v135_v3 = vld [vmem:[%s388_s0 + $0x58] sm:$0x7f]  }
   0x4   :  { %134 = vst.msk [vmem:[%s389_s1 + $0x3e] sm:$0x7c] %vm4_vm0, %v132_v2   ;;  %v138_v4 = vld [vmem:[%s388_s0 + $0x70] sm:$0x7f]   ;;  %v141_v5 = vld [vmem:[%s388_s0 + $0x88] sm:$0x7f]  }
   0x5   :  { %136 = vst.msk [vmem:[%s389_s1 + $0x45] sm:$0x7] %vm4_vm0, %v135_v3   ;;  %137 = vst.msk [vmem:[%s389_s1 + $0x55] sm:$0x78] %vm4_vm0, %v135_v3   ;;  %v144_v6 = vld [vmem:[%s388_s0 + $0xa0] sm:$0x7f]  }
   0x6   :  { %139 = vst.msk [vmem:[%s389_s1 + $0x5c] sm:$0xf] %vm4_vm0, %v138_v4   ;;  %140 = vst.msk [vmem:[%s389_s1 + $0x6c] sm:$0x70] %vm4_vm0, %v138_v4   ;;  %v49_v7 = vld [vmem:[%s388_s0] sm:$0x7f]  }
   0x7   :  { %142 = vst.msk [vmem:[%s389_s1 + $0x73] sm:$0x1f] %vm4_vm0, %v141_v5   ;;  %143 = vst.msk [vmem:[%s389_s1 + $0x83] sm:$0x60] %vm4_vm0, %v141_v5   ;;  %v147_v8 = vld [vmem:[%s388_s0 + $0x8] sm:$0x7f]  }
   0x8   :  { %145 = vst.msk [vmem:[%s389_s1 + $0x8a] sm:$0x3f] %vm4_vm0, %v144_v6   ;;  %146 = vst.msk [vmem:[%s389_s1 + $0x9a] sm:$0x40] %vm4_vm0, %v144_v6   ;;  %v149_v9 = vld [vmem:[%s388_s0 + $0x18] sm:$0x7f]  }
   0x9   :  { %50 = vst [vmem:[%s389_s1] sm:$0x7f] %v49_v7   ;;  %148 = vst [vmem:[%s389_s1 + $0x8] sm:$0x7f] %v147_v8   ;;  %v152_v10 = vld [vmem:[%s388_s0 + $0x20] sm:$0x7f]  }
   0xa   :  { %v155_v11 = vld [vmem:[%s388_s0 + $0x30] sm:$0x7f]   ;;  %150 = vst [vmem:[%s389_s1 + $0x7] ss:$17 sm:$0x3] %v149_v9  }
   0xb   :  { %151 = vst [vmem:[%s389_s1 + $0x17] sm:$0x7c] %v149_v9   ;;  %153 = vst [vmem:[%s389_s1 + $0xf] ss:$17 sm:$0x3] %v152_v10  }
   0xc   :  { %154 = vst [vmem:[%s389_s1 + $0x1f] sm:$0x7c] %v152_v10   ;;  %156 = vst [vmem:[%s389_s1 + $0x1e] sm:$0x3] %v155_v11   ;;  %v158_v12 = vld [vmem:[%s388_s0 + $0x38] sm:$0x7f]  }
   0xd   :  { %157 = vst [vmem:[%s389_s1 + $0x2e] sm:$0x7c] %v155_v11   ;;  %v161_v13 = vld [vmem:[%s388_s0 + $0x48] sm:$0x7f]   ;;  %v164_v14 = vld [vmem:[%s388_s0 + $0x50] sm:$0x7f]  }
   0xe   :  { %159 = vst [vmem:[%s389_s1 + $0x26] sm:$0x3] %v158_v12   ;;  %160 = vst [vmem:[%s389_s1 + $0x36] sm:$0x7c] %v158_v12   ;;  %v167_v15 = vld [vmem:[%s388_s0 + $0x60] sm:$0x7f]  }
   0xf   :  { %162 = vst [vmem:[%s389_s1 + $0x35] sm:$0x7] %v161_v13   ;;  %163 = vst [vmem:[%s389_s1 + $0x45] sm:$0x78] %v161_v13   ;;  %v170_v16 = vld [vmem:[%s388_s0 + $0x68] sm:$0x7f]  }
  0x10   :  { %165 = vst [vmem:[%s389_s1 + $0x3d] sm:$0x7] %v164_v14   ;;  %166 = vst [vmem:[%s389_s1 + $0x4d] sm:$0x78] %v164_v14   ;;  %v173_v17 = vld [vmem:[%s388_s0 + $0x78] sm:$0x7f]  }
  0x11   :  { %168 = vst [vmem:[%s389_s1 + $0x4c] sm:$0xf] %v167_v15   ;;  %169 = vst [vmem:[%s389_s1 + $0x5c] sm:$0x70] %v167_v15   ;;  %v176_v18 = vld [vmem:[%s388_s0 + $0x80] sm:$0x7f]  }
  0x12   :  { %171 = vst [vmem:[%s389_s1 + $0x54] sm:$0xf] %v170_v16   ;;  %172 = vst [vmem:[%s389_s1 + $0x64] sm:$0x70] %v170_v16   ;;  %v179_v19 = vld [vmem:[%s388_s0 + $0x90] sm:$0x7f]  }
  0x13   :  { %174 = vst [vmem:[%s389_s1 + $0x63] sm:$0x1f] %v173_v17   ;;  %175 = vst [vmem:[%s389_s1 + $0x73] sm:$0x60] %v173_v17   ;;  %v182_v20 = vld [vmem:[%s388_s0 + $0x98] sm:$0x7f]  }
  0x14   :  { %177 = vst [vmem:[%s389_s1 + $0x6b] sm:$0x1f] %v176_v18   ;;  %178 = vst [vmem:[%s389_s1 + $0x7b] sm:$0x60] %v176_v18  }
  0x15   :  { %180 = vst [vmem:[%s389_s1 + $0x7a] sm:$0x3f] %v179_v19   ;;  %181 = vst [vmem:[%s389_s1 + $0x8a] sm:$0x40] %v179_v19  }
  0x16   :  { %183 = vst [vmem:[%s389_s1 + $0x82] sm:$0x3f] %v182_v20   ;;  %184 = vst [vmem:[%s389_s1 + $0x92] sm:$0x40] %v182_v20  }

// kernel: fused_forward.1
= control target key start
LH: loop header
LB: loop body
LE: loop exit
PB: predicated region body
PF: predicated region fallthrough
CT: control target
= control target key end

     0   :  { %s3310_s18 = smov 0   ;;  %s4268_s0 = inlined_call_operand.vmem [shape: bf16[336,49], index: 0, kind: input, shape index: {}]   ;;  %s4269_s1 = inlined_call_operand.vmem [shape: f32[336,49], index: 1, kind: input, shape index: {}]   ;;  %s4270_s2 = inlined_call_operand.vmem [shape: bf16[336,336], index: 2, kind: input, shape index: {}]   ;;  %s4271_s3 = inlined_call_operand.vmem [shape: f32[336,1], index: 3, kind: input, shape index: {}]   ;;  %s4272_s4 = inlined_call_operand.vmem [shape: bf16[888,336], index: 4, kind: input, shape index: {}]   ;;  %s4273_s5 = inlined_call_operand.vmem [shape: f32[888,49], index: 5, kind: output, shape index: {}]  }
   0x1 LB: > { %s2579_s19 = sadd.s32 4294967295, %s3275_s18   ;;  %p2583_p0 = scmp.ge.s32.totalorder %s3275_s18, 1  ;;  %s3275_s18 = sphi %s3310_s18, %s15_s18  }
   0x2   : > { %p189_p1 = scmp.lt.s32.totalorder %s3275_s18, 4 }
   0x4   : > { %p190_p2 = pnand %p2583_p0, %p189_p1 }
   0x5   : > { %v3089_v0 = vld [vmem:[%s4268_s0] sm:$0xff] (!%p190_p2)   ;;  %v3277_v1 = vmov (!%p190_p2), 0   ;;  %v3090_v2 = vld [vmem:[%s4268_s0 + $0x8] sm:$0xff] (!%p190_p2)   ;;  %v3278_v3 = vmov (!%p190_p2), 0.0   ;;  %vm3279_vm0 = vmmov (!%p190_p2), 0   ;;  %v3091_v4 = vld [vmem:[%s4268_s0 + $0x10] sm:$0xff] (!%p190_p2)  }
   0x6   : > { %193 = sbr.rel (%p190_p2) target bundleno = 816 (0x330), region = 40  ;;  %863 = vmatprep.subr.bf16.mxu0 (!%p190_p2), %v3277_v1  ;;  %3087 = vset.pattern.permute.xlu0 (!%p190_p2), %v3277_v1  ;;  %v3092_v5 = vld [vmem:[%s4268_s0 + $0x18] sm:$0xff] (!%p190_p2)   ;;  %v3100_v6 = vld [vmem:[%s4268_s0 + $0x80] sm:$0xff] (!%p190_p2)   ;;  %v3102_v7 = vld [vmem:[%s4268_s0 + $0x88] sm:$0xff] (!%p190_p2)   ;;  %vm799_vm1 = vcmask (!%p190_p2), 654336   ;;  %vm2485_vm2 = vcmask (!%p190_p2), 400384  }
   0x7   : > { %864 = vmatpush1.bf16.msra.mxu0 (!%p190_p2), %v3089_v0  ;;  %2819 = vmatprep.subr.bf16.mxu1 (!%p190_p2), %v3278_v3  ;;  %v3093_v8 = vld [vmem:[%s4268_s0 + $0x20] sm:$0xff] (!%p190_p2)   ;;  %v3104_v9 = vld [vmem:[%s4268_s0 + $0x90] sm:$0xff] (!%p190_p2)   ;;  %v3094_v10 = vld [vmem:[%s4268_s0 + $0x28] sm:$0xff] (!%p190_p2)   ;;  %s218_s21 = smul.u32 (!%p190_p2), 37, %s2579_s19 }
   0x8   : > { %865 = vmatprep.subr.bf16.mxu0 (!%p190_p2), %v3277_v1  ;;  %2829 = vmatprep.mubr.msk.bf16.mxu1 (!%p190_p2), %vm3279_vm0, %v3278_v3  ;;  %v3106_v11 = vld [vmem:[%s4268_s0 + $0x98] sm:$0xff] (!%p190_p2)   ;;  %v3095_v12 = vld [vmem:[%s4268_s0 + $0x30] sm:$0xff] (!%p190_p2)   ;;  %v1349_v14 = vld [vmem:[%s4271_s3] sm:$0xff] (!%p190_p2) }
   0x9   : > { %3088 = vset.pattern.permute.xlu1 (!%p190_p2), %v3277_v1  ;;  %2820 = vmatpush3.bf16.msra.mxu1 (!%p190_p2), %v3100_v6  ;;  %v3113_v13 = vld [vmem:[%s4270_s2 + $0x4] ss:$12 sps:$4 sm:$0xff] (!%p190_p2)   ;;  %v3096_v16 = vld [vmem:[%s4268_s0 + $0x38] sm:$0xff] (!%p190_p2)   ;;  %v1350_v17 = vld [vmem:[%s4271_s3 + $0x8] sm:$0xff] (!%p190_p2)  ;;  %p219_p3 = scmp.lt.s32.totalorder (!%p190_p2), %s218_s21, 110 }
   0xa   : > { %2821 = vmatprep.subr.bf16.mxu1 (!%p190_p2), %v3278_v3  ;;  %1393 = vperm.xlu0 (!%p190_p2), %3087, %v1349_v14   ;;  %v3108_v15 = vld [vmem:[%s4268_s0 + $0xa0] sm:$0xff] (!%p190_p2)   ;;  %v3110_v18 = vld [vmem:[%s4270_s2 + $0x8] ss:$12 sps:$4 sm:$0xff] (!%p190_p2)   ;;  %v1352_v22 = vld [vmem:[%s4271_s3 + $0x18] sm:$0xff] (!%p190_p2) }
   0xb   : > { %866 = vmatpush1.bf16.msra.mxu0 (!%p190_p2), %v3090_v2  ;;  %895 = vmatprep.mubr.bf16.mxu0 (!%p190_p2), %v3113_v13  ;;  %v1353_v19 = vld [vmem:[%s4271_s3 + $0x20] sm:$0xff] (!%p190_p2)  ;;  %v1351_v20 = vld [vmem:[%s4271_s3 + $0x10] sm:$0xff] (!%p190_p2)  ;;  %v3098_v24 = vld [vmem:[%s4268_s0 + $0x48] sm:$0xff] (!%p190_p2)  }
   0xc   : > { %867 = vmatprep.subr.bf16.mxu0 (!%p190_p2), %v3277_v1  ;;  %v3097_v21 = vld [vmem:[%s4268_s0 + $0x40] sm:$0xff] (!%p190_p2)   ;;  %1403 = vperm.xlu1 (!%p190_p2), %3088, %v1351_v20   ;;  %v1355_v23 = vld [vmem:[%s4271_s3 + $0x30] sm:$0xff] (!%p190_p2)  ;;  %v1354_v25 = vld [vmem:[%s4271_s3 + $0x28] sm:$0xff] (!%p190_p2) }
   0xd   : > { %2822 = vmatpush3.bf16.msra.mxu1 %v3102_v7  ;;  %v3117_v26 = vld [vmem:[%s4270_s2 + $0x20] ss:$12 sps:$4 sm:$0xff]   ;;  %v3099_v28 = vld [vmem:[%s4268_s0 + $0x50] sm:$0xff]   ;;  %v1356_v29 = vld [vmem:[%s4271_s3 + $0x38] sm:$0xff]  ;;  %s4275_s21 = smov (!%p219_p3, %s218_s21), 110 }
   0xe   : > { %2823 = vmatprep.subr.bf16.mxu1 %v3278_v3  ;;  %1398 = vperm.xlu0 %3087, %v1350_v17   ;;  %v1357_v27 = vld [vmem:[%s4271_s3 + $0x40] sm:$0xff]  ;;  %v1359_v30 = vld [vmem:[%s4271_s3 + $0x50] sm:$0xff]  ;;  %v3101_v31 = vld [vmem:[%s4268_s0 + $0x58] sm:$0xff]   ;;  %s3075_s19 = smul.u32 12, %s4275_s21 }
   0xf   : > { %868 = vmatpush1.bf16.msra.mxu0 %v3091_v4  ;;  %v1358_v32 = vld [vmem:[%s4271_s3 + $0x48] sm:$0xff]  ;;  %v3121_v33 = vld [vmem:[%s4270_s2 + $0x38] ss:$12 sps:$4 sm:$0xff]   ;;  %v1363_v37 = vld [vmem:[%s4271_s3 + $0x70] sm:$0xff] }
  0x10   : > { %869 = vmatprep.subr.bf16.mxu0 %v3277_v1  ;;  %1408 = vperm.xlu1 %3088, %v1352_v22   ;;  %v1361_v34 = vld [vmem:[%s4271_s3 + $0x60] sm:$0xff]  ;;  %v1360_v36 = vld [vmem:[%s4271_s3 + $0x58] sm:$0xff]  ;;  %v3105_v38 = vld [vmem:[%s4268_s0 + $0x68] sm:$0xff]   ;;  %s3817_s28 = scalar_lea.vmem %s4272_s4, %s3075_s19 }
  0x11   : > { %2824 = vmatpush3.bf16.msra.mxu1 %v3104_v9  ;;  %v3103_v35 = vld [vmem:[%s4268_s0 + $0x60] sm:$0xff]   ;;  %v1362_v39 = vld [vmem:[%s4271_s3 + $0x68] sm:$0xff]  ;;  %v3125_v40 = vld [vmem:[%s4270_s2 + $0x50] ss:$12 sps:$4 sm:$0xff]  }
  0x12   : > { %2825 = vmatprep.subr.bf16.mxu1 %v3278_v3  ;;  %1413 = vperm.xlu0 %3087, %v1353_v19   ;;  %v1365_v41 = vld [vmem:[%s4271_s3 + $0x80] sm:$0xff]  ;;  %v3107_v42 = vld [vmem:[%s4268_s0 + $0x70] sm:$0xff]   ;;  %v1364_v43 = vld [vmem:[%s4271_s3 + $0x78] sm:$0xff] }
  0x13   : > { %870 = vmatpush1.bf16.msra.mxu0 %v3092_v5  ;;  %v1367_v44 = vld [vmem:[%s4271_s3 + $0x90] sm:$0xff]  ;;  %v3109_v45 = vld [vmem:[%s4268_s0 + $0x78] sm:$0xff]   ;;  %v1366_v46 = vld [vmem:[%s4271_s3 + $0x88] sm:$0xff] }
  0x14   : > { %871 = vmatprep.subr.bf16.mxu0 %v3277_v1  ;;  %1418 = vperm.xlu1 %3088, %v1354_v25   ;;  %v3111_v47 = vld [vmem:[%s4270_s2] ss:$12 sps:$4 sm:$0xff]   ;;  %v3129_v48 = vld [vmem:[%s4270_s2 + $0x68] ss:$12 sps:$4 sm:$0xff]   ;;  %v1368_v51 = vld [vmem:[%s4271_s3 + $0x98] sm:$0xff] }
  0x15   : > { %2826 = vmatpush3.bf16.msra.mxu1 %v3106_v11  ;;  %v1369_v49 = vld [vmem:[%s4271_s3 + $0xa0] sm:$0xff]  ;;  %v3114_v50 = vld [vmem:[%s4270_s2 + $0x1c] ss:$12 sps:$4 sm:$0xff]   ;;  %v1371_v52 = vld [vmem:[%s4271_s3 + $0xb0] sm:$0xff] }
  0x16   : > { %2827 = vmatprep.subr.bf16.mxu1 %v3278_v3  ;;  %1423 = vperm.xlu0 %3087, %v1355_v23   ;;  %v1370_v53 = vld [vmem:[%s4271_s3 + $0xa8] sm:$0xff]  ;;  %v3116_v54 = vld [vmem:[%s4270_s2 + $0x18] ss:$12 sps:$4 sm:$0xff]   ;;  %v3118_v57 = vld [vmem:[%s4270_s2 + $0x34] ss:$12 sps:$4 sm:$0xff]  }
  0x17   : > { %872 = vmatpush1.bf16.msra.mxu0 %v3093_v8  ;;  %v3133_v55 = vld [vmem:[%s4270_s2 + $0x80] ss:$12 sps:$4 sm:$0xff]   ;;  %v1372_v58 = vld [vmem:[%s4271_s3 + $0xb8] sm:$0xff]  ;;  %v1375_v59 = vld [vmem:[%s4271_s3 + $0xd0] sm:$0xff] }
  0x18   : > { %873 = vmatprep.subr.bf16.mxu0 %v3277_v1  ;;  %1428 = vperm.xlu1 %3088, %v1356_v29   ;;  %v1373_v56 = vld [vmem:[%s4271_s3 + $0xc0] sm:$0xff]  ;;  %v3120_v60 = vld [vmem:[%s4270_s2 + $0x30] ss:$12 sps:$4 sm:$0xff]   ;;  %v1374_v61 = vld [vmem:[%s4271_s3 + $0xc8] sm:$0xff] }
  0x19   : > { %2828 = vmatpush3.bf16.msra.mxu1 %v3108_v15  ;;  %v3137_v62 = vld [vmem:[%s4270_s2 + $0x98] ss:$12 sps:$4 sm:$0xff]   ;;  %v1379_v4 = vld [vmem:[%s4271_s3 + $0xf0] sm:$0xff]  ;;  %v1378_v5 = vld [vmem:[%s4271_s3 + $0xe8] sm:$0xff] }
  0x1a   : > { %2999 = vmatprep.subr.bf16.mxu1 %v3277_v1  ;;  %1433 = vperm.xlu0 %3087, %v1357_v27   ;;  %v1377_v63 = vld [vmem:[%s4271_s3 + $0xe0] sm:$0xff]  ;;  %v3122_v0 = vld [vmem:[%s4270_s2 + $0x4c] ss:$12 sps:$4 sm:$0xff]   ;;  %v3141_v6 = vld [vmem:[%s4270_s2 + $0xb0] ss:$12 sps:$4 sm:$0xff]  }
  0x1b   : > { %874 = vmatpush1.bf16.msra.mxu0 %v3094_v10  ;;  %v1376_v2 = vld [vmem:[%s4271_s3 + $0xd8] sm:$0xff]  ;;  %v3124_v7 = vld [vmem:[%s4270_s2 + $0x48] ss:$12 sps:$4 sm:$0xff]   ;;  %v1381_v8 = vld [vmem:[%s4271_s3 + $0x100] sm:$0xff] }
  0x1c   : > { %875 = vmatprep.subr.bf16.mxu0 %v3277_v1  ;;  %2830 = vmatmul.mubr.msk.bf16.vlgmr.msra.gmra.mrb[0].mxu1 %vm799_vm1, %v3110_v18  ;;  %v3126_v9 = vld [vmem:[%s4270_s2 + $0x64] ss:$12 sps:$4 sm:$0xff]   ;;  %v1380_v10 = vld [vmem:[%s4271_s3 + $0xf8] sm:$0xff]  ;;  %v3145_v13 = vld [vmem:[%s4270_s2 + $0xc8] ss:$12 sps:$4 sm:$0xff]  }
  0x1d   : > { %2833 = vmatprep.mubr.msk.bf16.mxu1 %vm3279_vm0, %v3278_v3  ;;  %1438 = vperm.xlu1 %3088, %v1358_v32   ;;  %v1383_v11 = vld [vmem:[%s4271_s3 + $0x110] sm:$0xff]  ;;  %v3128_v14 = vld [vmem:[%s4270_s2 + $0x60] ss:$12 sps:$4 sm:$0xff]   ;;  %v1384_v17 = vld [vmem:[%s4271_s3 + $0x118] sm:$0xff] }
  0x1e   : > { %1443 = vperm.xlu0 %3087, %v1359_v30   ;;  %v1385_v15 = vld [vmem:[%s4271_s3 + $0x120] sm:$0xff]  ;;  %v1387_v18 = vld [vmem:[%s4271_s3 + $0x130] sm:$0xff]  ;;  %v1386_v19 = vld [vmem:[%s4271_s3 + $0x128] sm:$0xff] }
  0x1f   : > { %876 = vmatpush1.bf16.msra.mxu0 %v3095_v12  ;;  %v1382_v12 = vld [vmem:[%s4271_s3 + $0x108] sm:$0xff]  ;;  %v1389_v22 = vld [vmem:[%s4271_s3 + $0x140] sm:$0xff]  ;;  %v3136_v27 = vld [vmem:[%s4270_s2 + $0x90] ss:$12 sps:$4 sm:$0xff]  }
  0x20   : > { %877 = vmatprep.subr.bf16.mxu0 %v3277_v1  ;;  %v3149_v20 = vld [vmem:[%s4270_s2 + $0xe0] ss:$12 sps:$4 sm:$0xff]   ;;  %v3157_v29 = vld [vmem:[%s4270_s2 + $0x110] ss:$12 sps:$4 sm:$0xff]   ;;  %v3140_v30 = vld [vmem:[%s4270_s2 + $0xa8] ss:$12 sps:$4 sm:$0xff]  }
  0x21   : > { %1448 = vperm.xlu1 %3088, %v1360_v36   ;;  %v3134_v23 = vld [vmem:[%s4270_s2 + $0x94] ss:$12 sps:$4 sm:$0xff]   ;;  %v1390_v25 = vld [vmem:[%s4271_s3 + $0x148] sm:$0xff]  ;;  %v3148_v36 = vld [vmem:[%s4270_s2 + $0xd8] ss:$12 sps:$4 sm:$0xff]  }
  0x22   : > { %1453 = vperm.xlu0 %3087, %v1361_v34   ;;  %v3161_v32 = vld [vmem:[%s4270_s2 + $0x128] ss:$12 sps:$4 sm:$0xff]  }
  0x23   : > { %878 = vmatpush1.bf16.msra.mxu0 %v3096_v16  ;;  %v3130_v16 = vld [vmem:[%s4270_s2 + $0x7c] ss:$12 sps:$4 sm:$0xff]  }
  0x24   : > { %879 = vmatprep.subr.bf16.mxu0 %v3277_v1  ;;  %2834 = vmatmul.mubr.msk.bf16.gmra.mrb[4].mxu1 %vm799_vm1, %v3117_v26  ;;  %v3153_v26 = vld [vmem:[%s4270_s2 + $0xf8] ss:$12 sps:$4 sm:$0xff]   ;;  %v3146_v34 = vld [vmem:[%s4270_s2 + $0xdc] ss:$12 sps:$4 sm:$0xff]  }
  0x25   : > { %2837 = vmatprep.mubr.msk.bf16.mxu1 %vm3279_vm0, %v3278_v3  ;;  %1458 = vperm.xlu1 %3088, %v1362_v39   ;;  %v3152_v39 = vld [vmem:[%s4270_s2 + $0xf0] ss:$12 sps:$4 sm:$0xff]  }
  0x26   : > { %1463 = vperm.xlu0 %3087, %v1363_v37   ;;  %v3150_v37 = vld [vmem:[%s4270_s2 + $0xf4] ss:$12 sps:$4 sm:$0xff]  }
  0x27   : > { %880 = vmatpush1.bf16.msra.mxu0 %v3097_v21  ;;  %v3132_v21 = vld [vmem:[%s4270_s2 + $0x78] ss:$12 sps:$4 sm:$0xff]  }
  0x28   : > { %881 = vmatprep.subr.bf16.mxu0 %v3277_v1 }
  0x29   : > { %1468 = vperm.xlu1 %3088, %v1364_v43   ;;  %v3158_v43 = vld [vmem:[%s4270_s2 + $0x124] ss:$12 sps:$4 sm:$0xff]  }
  0x2a   : > { %1473 = vperm.xlu0 %3087, %v1365_v41   ;;  %v3173_v41 = vld [vmem:[%s4270_s2 + $0x170] ss:$12 sps:$4 sm:$0xff]  }
  0x2b   : > { %882 = vmatpush1.bf16.msra.mxu0 %v3098_v24  ;;  %v1388_v24 = vld [vmem:[%s4271_s3 + $0x138] sm:$0xff] }
  0x2c   : > { %883 = vmatprep.subr.bf16.mxu0 %v3277_v1  ;;  %2838 = vmatmul.mubr.msk.bf16.gmra.mrb[8].mxu1 %vm799_vm1, %v3121_v33  ;;  %v3144_v33 = vld [vmem:[%s4270_s2 + $0xc0] ss:$12 sps:$4 sm:$0xff]  }
  0x2d   : > { %2841 = vmatprep.mubr.msk.bf16.mxu1 %vm3279_vm0, %v3278_v3  ;;  %1478 = vperm.xlu1 %3088, %v1366_v46   ;;  %v3162_v46 = vld [vmem:[%s4270_s2 + $0x13c] ss:$12 sps:$4 sm:$0xff]  }
  0x2e   : > { %1483 = vperm.xlu0 %3087, %v1367_v44   ;;  %v3177_v44 = vld [vmem:[%s4270_s2 + $0x188] ss:$12 sps:$4 sm:$0xff]  }
  0x2f   : > { %884 = vmatpush1.bf16.msra.mxu0 %v3099_v28  ;;  %v3138_v28 = vld [vmem:[%s4270_s2 + $0xac] ss:$12 sps:$4 sm:$0xff]  }
  0x30   : > { %885 = vmatprep.subr.bf16.mxu0 %v3277_v1 }
  0x31   : > { %1488 = vperm.xlu1 %3088, %v1368_v51   ;;  %v3168_v51 = vld [vmem:[%s4270_s2 + $0x150] ss:$12 sps:$4 sm:$0xff]  }
  0x32   : > { %1493 = vperm.xlu0 %3087, %v1369_v49   ;;  %v3166_v49 = vld [vmem:[%s4270_s2 + $0x154] ss:$12 sps:$4 sm:$0xff]  }
  0x33   : > { %886 = vmatpush1.bf16.msra.mxu0 %v3101_v31  ;;  %v3142_v31 = vld [vmem:[%s4270_s2 + $0xc4] ss:$12 sps:$4 sm:$0xff]  }
  0x34   : > { %887 = vmatprep.subr.bf16.mxu0 %v3277_v1  ;;  %2842 = vmatmul.mubr.msk.bf16.gmra.mrb[12].mxu1 %vm799_vm1, %v3125_v40  ;;  %v3154_v40 = vld [vmem:[%s4270_s2 + $0x10c] ss:$12 sps:$4 sm:$0xff]  }
  0x35   : > { %2845 = vmatprep.mubr.msk.bf16.mxu1 %vm3279_vm0, %v3278_v3  ;;  %1498 = vperm.xlu1 %3088, %v1370_v53   ;;  %v3189_v53 = vld [vmem:[%s4270_s2 + $0x1d0] ss:$12 sps:$4 sm:$0xff]  }
  0x36   : > { %1503 = vperm.xlu0 %3087, %v1371_v52   ;;  %v3170_v52 = vld [vmem:[%s4270_s2 + $0x16c] ss:$12 sps:$4 sm:$0xff]  }
  0x37   : > { %888 = vmatpush1.bf16.msra.mxu0 %v3103_v35  ;;  %v3165_v35 = vld [vmem:[%s4270_s2 + $0x140] ss:$12 sps:$4 sm:$0xff]  }
  0x38   : > { %889 = vmatprep.subr.bf16.mxu0 %v3277_v1 }
  0x39   : > { %1508 = vperm.xlu1 %3088, %v1372_v58   ;;  %v3178_v58 = vld [vmem:[%s4270_s2 + $0x19c] ss:$12 sps:$4 sm:$0xff]  }
  0x3a   : > { %1513 = vperm.xlu0 %3087, %v1373_v56   ;;  %v3193_v56 = vld [vmem:[%s4270_s2 + $0x1e8] ss:$12 sps:$4 sm:$0xff]  }
  0x3b   : > { %890 = vmatpush1.bf16.msra.mxu0 %v3105_v38  ;;  %v3169_v38 = vld [vmem:[%s4270_s2 + $0x158] ss:$12 sps:$4 sm:$0xff]  }
  0x3c   : > { %891 = vmatprep.subr.bf16.mxu0 %v3277_v1  ;;  %2846 = vmatmul.mubr.msk.bf16.gmra.mrb[16].mxu1 %vm799_vm1, %v3129_v48  ;;  %v3164_v48 = vld [vmem:[%s4270_s2 + $0x138] ss:$12 sps:$4 sm:$0xff]  }
  0x3d   : > { %2849 = vmatprep.mubr.msk.bf16.mxu1 %vm3279_vm0, %v3278_v3  ;;  %1518 = vperm.xlu1 %3088, %v1374_v61   ;;  %v3184_v61 = vld [vmem:[%s4270_s2 + $0x1b0] ss:$12 sps:$4 sm:$0xff]  }
  0x3e   : > { %1523 = vperm.xlu0 %3087, %v1375_v59   ;;  %v3180_v59 = vld [vmem:[%s4270_s2 + $0x198] ss:$12 sps:$4 sm:$0xff]  }
  0x3f   : > { %892 = vmatpush1.bf16.msra.mxu0 %v3107_v42  ;;  %v3156_v42 = vld [vmem:[%s4270_s2 + $0x108] ss:$12 sps:$4 sm:$0xff]  }
  0x40   : > { %893 = vmatprep.subr.bf16.mxu0 %v3277_v1 }
  0x41   : > { %1528 = vperm.xlu1 %3088, %v1376_v2   ;;  %v3192_v2 = vld [vmem:[%s4270_s2 + $0x1e0] ss:$12 sps:$4 sm:$0xff]  }
  0x42   : > { %1533 = vperm.xlu0 %3087, %v1377_v63   ;;  %v3188_v63 = vld [vmem:[%s4270_s2 + $0x1c8] ss:$12 sps:$4 sm:$0xff]  }
  0x43   : > { %894 = vmatpush1.bf16.msra.mxu0 %v3109_v45  ;;  %v3160_v45 = vld [vmem:[%s4270_s2 + $0x120] ss:$12 sps:$4 sm:$0xff]  }
  0x44   : > { %2117 = vmatprep.subr.bf16.mxu0 %v3277_v1  ;;  %2850 = vmatmul.mubr.msk.bf16.gmra.mrb[20].mxu1 %vm799_vm1, %v3133_v55  ;;  %v3174_v55 = vld [vmem:[%s4270_s2 + $0x184] ss:$12 sps:$4 sm:$0xff]  }
  0x45   : > { %2853 = vmatprep.mubr.msk.bf16.mxu1 %vm3279_vm0, %v3278_v3  ;;  %1538 = vperm.xlu1 %3088, %v1378_v5  }
  0x46   : > { %896 = vmatmul.mubr.bf16.vlgmr.msra.gmra.mrb[0].mxu0 %v3111_v47  ;;  %1543 = vperm.xlu0 %3087, %v1379_v4   ;;  %v3181_v47 = vld [vmem:[%s4270_s2 + $0x1a0] ss:$12 sps:$4 sm:$0xff]  }
  0x47   : > { %903 = vmatprep.mubr.bf16.mxu0 %v3114_v50  ;;  %v3185_v50 = vld [vmem:[%s4270_s2 + $0x1b8] ss:$12 sps:$4 sm:$0xff]  }
  0x49   : > { %1548 = vperm.xlu1 %3088, %v1380_v10  }
  0x4a   : > { %1553 = vperm.xlu0 %3087, %v1381_v8  }
  0x4c   : > { %2854 = vmatmul.mubr.msk.bf16.gmra.mrb[24].mxu1 %vm799_vm1, %v3137_v62  ;;  %v3186_v62 = vld [vmem:[%s4270_s2 + $0x1cc] ss:$12 sps:$4 sm:$0xff]  }
  0x4d   : > { %2857 = vmatprep.mubr.msk.bf16.mxu1 %vm3279_vm0, %v3278_v3  ;;  %1558 = vperm.xlu1 %3088, %v1382_v12  }
  0x4e   : > { %904 = vmatmul.mubr.bf16.gmra.mrb[4].mxu0 %v3116_v54  ;;  %1563 = vperm.xlu0 %3087, %v1383_v11   ;;  %v3172_v54 = vld [vmem:[%s4270_s2 + $0x168] ss:$12 sps:$4 sm:$0xff]  }
  0x4f   : > { %911 = vmatprep.mubr.bf16.mxu0 %v3118_v57  ;;  %v3176_v57 = vld [vmem:[%s4270_s2 + $0x180] ss:$12 sps:$4 sm:$0xff]  }
  0x51   : > { %1568 = vperm.xlu1 %3088, %v1384_v17  }
  0x52   : > { %1573 = vperm.xlu0 %3087, %v1385_v15  }
  0x54   : > { %2858 = vmatmul.mubr.msk.bf16.gmra.mrb[28].mxu1 %vm799_vm1, %v3141_v6 }
  0x55   : > { %2861 = vmatprep.mubr.msk.bf16.mxu1 %vm3279_vm0, %v3278_v3  ;;  %1578 = vperm.xlu1 %3088, %v1386_v19  }
  0x56   : > { %912 = vmatmul.mubr.bf16.gmra.mrb[8].mxu0 %v3120_v60  ;;  %1583 = vperm.xlu0 %3087, %v1387_v18   ;;  %v3182_v60 = vld [vmem:[%s4270_s2 + $0x1b4] ss:$12 sps:$4 sm:$0xff]  }
  0x57   : > { %919 = vmatprep.mubr.bf16.mxu0 %v3122_v0  ;;  %v3190_v0 = vld [vmem:[%s4270_s2 + $0x1e4] ss:$12 sps:$4 sm:$0xff]  }
  0x59   : > { %1588 = vperm.xlu1 %3088, %v1388_v24  }
  0x5a   : > { %1593 = vperm.xlu0 %3087, %v1389_v22  }
  0x5c   : > { %2862 = vmatmul.mubr.msk.bf16.gmra.mrb[32].mxu1 %vm799_vm1, %v3145_v13 }
  0x5d   : > { %2865 = vmatprep.mubr.msk.bf16.mxu1 %vm3279_vm0, %v3278_v3  ;;  %1598 = vperm.xlu1 %3088, %v1390_v25  }
  0x5e   : > { %920 = vmatmul.mubr.bf16.gmra.mrb[12].mxu0 %v3124_v7 }
  0x5f   : > { %927 = vmatprep.mubr.bf16.mxu0 %v3126_v9 }
  0x64   : > { %2866 = vmatmul.mubr.msk.bf16.gmra.mrb[36].mxu1 %vm799_vm1, %v3149_v20 }
  0x65   : > { %2869 = vmatprep.mubr.msk.bf16.mxu1 %vm3279_vm0, %v3278_v3 }
  0x66   : > { %928 = vmatmul.mubr.bf16.gmra.mrb[16].mxu0 %v3128_v14 }
  0x67   : > { %935 = vmatprep.mubr.bf16.mxu0 %v3130_v16 }
  0x6c   : > { %2870 = vmatmul.mubr.msk.bf16.gmra.mrb[40].mxu1 %vm799_vm1, %v3153_v26 }
  0x6d   : > { %2873 = vmatprep.mubr.msk.bf16.mxu1 %vm3279_vm0, %v3278_v3 }
  0x6e   : > { %936 = vmatmul.mubr.bf16.gmra.mrb[20].mxu0 %v3132_v21 }
  0x6f   : > { %943 = vmatprep.mubr.bf16.mxu0 %v3134_v23  ;;  %v1265_v23 = vld [vmem:[%s4269_s1] sm:$0xff] }
  0x74   : > { %2874 = vmatmul.mubr.msk.bf16.gmra.mrb[44].mxu1 %vm799_vm1, %v3157_v29  ;;  %v1266_v29 = vld [vmem:[%s4269_s1 + $0x8] sm:$0xff] }
  0x75   : > { %2877 = vmatprep.mubr.msk.bf16.mxu1 %vm3279_vm0, %v3278_v3 }
  0x76   : > { %944 = vmatmul.mubr.bf16.gmra.mrb[24].mxu0 %v3136_v27 }
  0x77   : > { %951 = vmatprep.mubr.bf16.mxu0 %v3138_v28 }
  0x7c   : > { %2878 = vmatmul.mubr.msk.bf16.gmra.mrb[48].mxu1 %vm799_vm1, %v3161_v32 }
  0x7d   : > { %2881 = vmatprep.mubr.msk.bf16.mxu1 %vm3279_vm0, %v3278_v3 }
  0x7e   : > { %952 = vmatmul.mubr.bf16.gmra.mrb[28].mxu0 %v3140_v30 }
  0x7f   : > { %959 = vmatprep.mubr.bf16.mxu0 %v3142_v31 }
  0x84   : > { %2882 = vmatmul.mubr.msk.bf16.gmra.mrb[52].mxu1 %vm799_vm1, %v3165_v35 }
  0x85   : > { %2885 = vmatprep.mubr.msk.bf16.mxu1 %vm3279_vm0, %v3278_v3 }
  0x86   : > { %960 = vmatmul.mubr.bf16.gmra.mrb[32].mxu0 %v3144_v33 }
  0x87   : > { %967 = vmatprep.mubr.bf16.mxu0 %v3146_v34 }
  0x89   : > { %v1394_v20 = vpop.permute.xlu0 %1393 }
  0x8c   : > { %2886 = vmatmul.mubr.msk.bf16.gmra.mrb[56].mxu1 %vm799_vm1, %v3169_v38 }
  0x8d   : > { %2889 = vmatprep.mubr.msk.bf16.mxu1 %vm3279_vm0, %v3278_v3 }
  0x8e   : > { %968 = vmatmul.mubr.bf16.gmra.mrb[36].mxu0 %v3148_v36  ;;  %v1399_v36 = vpop.permute.xlu0 %1398 }
  0x8f   : > { %975 = vmatprep.mubr.bf16.mxu0 %v3150_v37  ;;  %v1404_v37 = vpop.permute.xlu1 %1403 }
  0x94   : > { %2890 = vmatmul.mubr.msk.bf16.gmra.mrb[60].mxu1 %vm799_vm1, %v3173_v41  ;;  %v1267_v41 = vld [vmem:[%s4269_s1 + $0x10] sm:$0xff] }
  0x95   : > { %2893 = vmatprep.mubr.msk.bf16.mxu1 %vm3279_vm0, %v3278_v3 }
  0x96   : > { %976 = vmatmul.mubr.bf16.gmra.mrb[40].mxu0 %v3152_v39 }
  0x97   : > { %983 = vmatprep.mubr.bf16.mxu0 %v3154_v40 }
  0x9c   : > { %2894 = vmatmul.mubr.msk.bf16.gmra.mrb[64].mxu1 %vm799_vm1, %v3177_v44 }
  0x9d   : > { %2897 = vmatprep.mubr.msk.bf16.mxu1 %vm3279_vm0, %v3278_v3 }
  0x9e   : > { %984 = vmatmul.mubr.bf16.gmra.mrb[44].mxu0 %v3156_v42 }
  0x9f   : > { %991 = vmatprep.mubr.bf16.mxu0 %v3158_v43 }
  0xa4   : > { %2898 = vmatmul.mubr.msk.bf16.gmra.mrb[68].mxu1 %vm799_vm1, %v3181_v47 }
  0xa5   : > { %2901 = vmatprep.mubr.msk.bf16.mxu1 %vm3279_vm0, %v3278_v3 }
  0xa6   : > { %992 = vmatmul.mubr.bf16.gmra.mrb[48].mxu0 %v3160_v45 }
  0xa7   : > { %999 = vmatprep.mubr.bf16.mxu0 %v3162_v46 }
  0xac   : > { %2902 = vmatmul.mubr.msk.bf16.gmra.mrb[72].mxu1 %vm799_vm1, %v3185_v50 }
  0xad   : > { %2905 = vmatprep.mubr.msk.bf16.mxu1 %vm3279_vm0, %v3278_v3 }
  0xae   : > { %1000 = vmatmul.mubr.bf16.gmra.mrb[52].mxu0 %v3164_v48 }
  0xaf   : > { %1007 = vmatprep.mubr.bf16.mxu0 %v3166_v49  ;;  %v1268_v49 = vld [vmem:[%s4269_s1 + $0x18] sm:$0xff] }
  0xb4   : > { %2906 = vmatmul.mubr.msk.bf16.gmra.mrb[76].mxu1 %vm799_vm1, %v3189_v53 }
  0xb5   : > { %2909 = vmatprep.mubr.msk.bf16.mxu1 %vm3279_vm0, %v3278_v3 }
  0xb6   : > { %1008 = vmatmul.mubr.bf16.gmra.mrb[56].mxu0 %v3168_v51 }
  0xb7   : > { %1015 = vmatprep.mubr.bf16.mxu0 %v3170_v52 }
  0xbc   : > { %2910 = vmatmul.mubr.msk.bf16.gmra.mrb[80].mxu1 %vm799_vm1, %v3193_v56 }
  0xbe   : > { %1016 = vmatmul.mubr.bf16.gmra.mrb[60].mxu0 %v3172_v54 }
  0xbf   : > { %1023 = vmatprep.mubr.bf16.mxu0 %v3174_v55  ;;  %v3196_v55 = vld [vmem:[%s3817_s28 + $0x184] ss:$12 sps:$4 sm:$0xff]  }
  0xc0   : > { %2277 = vmatprep.mubr.bf16.mxu1 %v3196_v55 }
  0xc6   : > { %1024 = vmatmul.mubr.bf16.gmra.mrb[64].mxu0 %v3176_v57 }
  0xc7   : > { %1031 = vmatprep.mubr.bf16.mxu0 %v3178_v58  ;;  %v1409_v58 = vpop.permute.xlu1 %1408 }
  0xce   : > { %1032 = vmatmul.mubr.bf16.gmra.mrb[68].mxu0 %v3180_v59  ;;  %v1269_v59 = vld [vmem:[%s4269_s1 + $0x20] sm:$0xff] }
  0xcf   : > { %1039 = vmatprep.mubr.bf16.mxu0 %v3182_v60 }
  0xd6   : > { %1040 = vmatmul.mubr.bf16.gmra.mrb[72].mxu0 %v3184_v61 }
  0xd7   : > { %1047 = vmatprep.mubr.bf16.mxu0 %v3186_v62 }
  0xde   : > { %1048 = vmatmul.mubr.bf16.gmra.mrb[76].mxu0 %v3188_v63 }
  0xdf   : > { %1055 = vmatprep.mubr.bf16.mxu0 %v3190_v0 }
  0xe6   : > { %1056 = vmatmul.mubr.bf16.gmra.mrb[80].mxu0 %v3192_v2 }
  0xef   : > { %v1098_v4 = vpop.f32.mrb[0].mxu1 }
  0xf0   : > { %v2831_v5 = vpop.f32.mrb[1].mxu1 }
  0xf1   : > { %v1101_v6 = vpop.f32.mrb[2].mxu1 }
  0xf2   : > { %v2832_v7 = vpop.f32.mrb[3].mxu1 }
  0xf7   : > { %v1106_v8 = vpop.f32.mrb[4].mxu1 }
  0xf8   : > { %v2835_v9 = vpop.f32.mrb[5].mxu1 }
  0xf9   : > { %v1109_v10 = vpop.f32.mrb[6].mxu1 }
  0xfa   : > { %v2836_v11 = vpop.f32.mrb[7].mxu1 }
  0xff   : > { %v3784_v12 = vpop.f32.mrb[8].mxu1 }
 0x100   : > { %v2839_v13 = vpop.f32.mrb[9].mxu1 }
 0x101   : > { %v3786_v14 = vpop.f32.mrb[10].mxu1 }
 0x102   : > { %v2840_v15 = vpop.f32.mrb[11].mxu1 }
 0x107   : > { %v3788_v16 = vpop.f32.mrb[12].mxu1 }
 0x108   : > { %v2843_v17 = vpop.f32.mrb[13].mxu1 }
 0x109   : > { %v3790_v18 = vpop.f32.mrb[14].mxu1  ;;  %v1414_v17 = vpop.permute.xlu0 %1413 }
 0x10a   : > { %v2844_v19 = vpop.f32.mrb[15].mxu1 }
 0x10f   : > { %v3792_v21 = vpop.f32.mrb[16].mxu1 }
 0x110   : > { %v2847_v24 = vpop.f32.mrb[17].mxu1 }
 0x111   : > { %v3797_v27 = vpop.f32.mrb[18].mxu1 }
 0x112   : > { %v2848_v30 = vpop.f32.mrb[19].mxu1 }
 0x117   : > { %v3806_v39 = vpop.f32.mrb[20].mxu1 }
 0x118   : > { %v2851_v42 = vpop.f32.mrb[21].mxu1 }
 0x119   : > { %v897_v22 = vpop.f32.mrb[0].mxu0  ;;  %v3812_v47 = vpop.f32.mrb[22].mxu1 }
 0x11a   : > { %v1099_v25 = vadd.f32 %v1098_v4, %v897_v22  ;;  %v899_v26 = vpop.f32.mrb[1].mxu0  ;;  %v2852_v50 = vpop.f32.mrb[23].mxu1  ;;  %v1271_v22 = vld [vmem:[%s4269_s1 + $0x30] sm:$0xff] }
 0x11b   : > { %v900_v28 = vpop.f32.mrb[2].mxu0 }
 0x11c   : > { %v1307_v31 = vadd.f32 %v1265_v23, %v1099_v25  ;;  %v1102_v32 = vadd.f32 %v1101_v6, %v900_v28  ;;  %v902_v33 = vpop.f32.mrb[3].mxu0 }
 0x11d   : > { %v1272_v33 = vld [vmem:[%s4269_s1 + $0x38] sm:$0xff] }
 0x11e   : > { %v1601_v34 = vadd.f32 %v1394_v20, %v1307_v31  ;;  %v1308_v35 = vadd.f32 %v1266_v29, %v1102_v32 }
 0x11f   : > { %v3828_v62 = vpop.f32.mrb[24].mxu1 }
 0x120   : > { %v1602_v38 = vadd.f32 %v1399_v36, %v1308_v35  ;;  %v1643_v43 = vmax.f32 %v1601_v34, 0.0  ;;  %v2855_v0 = vpop.f32.mrb[25].mxu1 }
 0x121   : > { %v905_v40 = vpop.f32.mrb[4].mxu0  ;;  %v3831_v6 = vpop.f32.mrb[26].mxu1 }
 0x122   : > { %v1644_v44 = vmax.f32 %v1602_v38, 0.0  ;;  %v1107_v45 = vadd.f32 %v1106_v8, %v905_v40  ;;  %v907_v46 = vpop.f32.mrb[5].mxu0  ;;  %v1270_v8 = vld [vmem:[%s4269_s1 + $0x28] sm:$0xff]  ;;  %v2856_v9 = vpop.f32.mrb[27].mxu1 }
 0x123   : > { %v908_v48 = vpop.f32.mrb[6].mxu0  ;;  %v1424_v40 = vpop.permute.xlu0 %1423 }
 0x124   : > { %v1759_v51 = vpack.c.bf16 %v1644_v44, %v1643_v43  ;;  %v1309_v52 = vadd.f32 %v1267_v41, %v1107_v45  ;;  %v1110_v53 = vadd.f32 %v1109_v10, %v908_v48  ;;  %v910_v54 = vpop.f32.mrb[7].mxu0  ;;  %v1273_v43 = vld [vmem:[%s4269_s1 + $0x40] sm:$0xff] }
 0x125   : > { %v1274_v54 = vld [vmem:[%s4269_s1 + $0x48] sm:$0xff] }
 0x126   : > { %v1603_v56 = vadd.f32 %v1404_v37, %v1309_v52  ;;  %v1310_v57 = vadd.f32 %v1268_v49, %v1110_v53  ;;  %2118 = vmatpush1.bf16.msra.mxu0 %v1759_v51  ;;  %3015 = vmatpush1.bf16.msra.mxu1 %v1759_v51 }
 0x127   : > { %2119 = vmatprep.subr.bf16.mxu0 %v3277_v1  ;;  %3000 = vmatprep.subr.bf16.mxu1 %v3277_v1  ;;  %v3842_v25 = vpop.f32.mrb[28].mxu1 }
 0x128   : > { %v1645_v60 = vmax.f32 %v1603_v56, 0.0  ;;  %v1604_v61 = vadd.f32 %v1409_v58, %v1310_v57  ;;  %v2859_v26 = vpop.f32.mrb[29].mxu1 }
 0x129   : > { %v913_v63 = vpop.f32.mrb[8].mxu0  ;;  %v3845_v31 = vpop.f32.mrb[30].mxu1 }
 0x12a   : > { %v1646_v2 = vmax.f32 %v1604_v61, 0.0  ;;  %v1115_v4 = vadd.f32 %v3784_v12, %v913_v63  ;;  %v915_v5 = vpop.f32.mrb[9].mxu0  ;;  %v1419_v12 = vpop.permute.xlu1 %1418 }
 0x12b   : > { %v916_v7 = vpop.f32.mrb[10].mxu0  ;;  %v2860_v34 = vpop.f32.mrb[31].mxu1  ;;  %v1275_v5 = vld [vmem:[%s4269_s1 + $0x50] sm:$0xff] }
 0x12c   : > { %v1760_v10 = vpack.c.bf16 %v1646_v2, %v1645_v60  ;;  %v1311_v11 = vadd.f32 %v1269_v59, %v1115_v4  ;;  %v1118_v13 = vadd.f32 %v3786_v14, %v916_v7  ;;  %v918_v15 = vpop.f32.mrb[11].mxu0  ;;  %v1434_v60 = vpop.permute.xlu0 %1433 }
 0x12d   : > { %v1276_v15 = vld [vmem:[%s4269_s1 + $0x58] sm:$0xff] }
 0x12e   : > { %v1605_v19 = vadd.f32 %v1414_v17, %v1311_v11  ;;  %v1312_v20 = vadd.f32 %v1270_v8, %v1118_v13  ;;  %2120 = vmatpush1.bf16.msra.mxu0 %v1760_v10  ;;  %3016 = vmatpush1.bf16.msra.mxu1 %v1760_v10 }
 0x12f   : > { %2121 = vmatprep.subr.bf16.mxu0 %v3277_v1  ;;  %3001 = vmatprep.subr.bf16.mxu1 %v3277_v1  ;;  %v3856_v46 = vpop.f32.mrb[32].mxu1 }
 0x130   : > { %v1647_v23 = vmax.f32 %v1605_v19, 0.0  ;;  %v1606_v24 = vadd.f32 %v1419_v12, %v1312_v20  ;;  %v2863_v48 = vpop.f32.mrb[33].mxu1 }
 0x131   : > { %v921_v14 = vpop.f32.mrb[12].mxu0  ;;  %v3859_v52 = vpop.f32.mrb[34].mxu1 }
 0x132   : > { %v1648_v28 = vmax.f32 %v1606_v24, 0.0  ;;  %v1123_v29 = vadd.f32 %v3788_v16, %v921_v14  ;;  %v923_v30 = vpop.f32.mrb[13].mxu0  ;;  %v1429_v16 = vpop.permute.xlu1 %1428 }
 0x133   : > { %v924_v32 = vpop.f32.mrb[14].mxu0  ;;  %v2864_v55 = vpop.f32.mrb[35].mxu1 }
 0x134   : > { %v1761_v35 = vpack.c.bf16 %v1648_v28, %v1647_v23  ;;  %v1313_v36 = vadd.f32 %v1271_v22, %v1123_v29  ;;  %v1126_v37 = vadd.f32 %v3790_v18, %v924_v32  ;;  %v926_v38 = vpop.f32.mrb[15].mxu0  ;;  %v1444_v23 = vpop.permute.xlu0 %1443 }
 0x136   : > { %v1607_v41 = vadd.f32 %v1424_v40, %v1313_v36  ;;  %v1314_v42 = vadd.f32 %v1272_v33, %v1126_v37  ;;  %2122 = vmatpush1.bf16.msra.mxu0 %v1761_v35  ;;  %3017 = vmatpush1.bf16.msra.mxu1 %v1761_v35  ;;  %v1278_v40 = vld [vmem:[%s4269_s1 + $0x68] sm:$0xff] }
 0x137   : > { %2123 = vmatprep.subr.bf16.mxu0 %v3277_v1  ;;  %3002 = vmatprep.subr.bf16.mxu1 %v3277_v1  ;;  %v3867_v2 = vpop.f32.mrb[36].mxu1 }
 0x138   : > { %v1649_v44 = vmax.f32 %v1607_v41, 0.0  ;;  %v1608_v45 = vadd.f32 %v1429_v16, %v1314_v42 }
 0x139   : > { %v929_v18 = vpop.f32.mrb[16].mxu0 }
 0x13a   : > { %v1650_v49 = vmax.f32 %v1608_v45, 0.0  ;;  %v1131_v50 = vadd.f32 %v3792_v21, %v929_v18  ;;  %v931_v51 = vpop.f32.mrb[17].mxu0  ;;  %v1439_v21 = vpop.permute.xlu1 %1438 }
 0x13b   : > { %v932_v53 = vpop.f32.mrb[18].mxu0  ;;  %v1454_v45 = vpop.permute.xlu0 %1453 }
 0x13c   : > { %v1762_v56 = vpack.c.bf16 %v1650_v49, %v1649_v44  ;;  %v1315_v57 = vadd.f32 %v1273_v43, %v1131_v50  ;;  %v1134_v58 = vadd.f32 %v3797_v27, %v932_v53  ;;  %v934_v59 = vpop.f32.mrb[19].mxu0  ;;  %v2867_v27 = vpop.f32.mrb[37].mxu1  ;;  %v1279_v53 = vld [vmem:[%s4269_s1 + $0x70] sm:$0xff] }
 0x13d   : > { %v3873_v11 = vpop.f32.mrb[38].mxu1 }
 0x13e   : > { %v1609_v61 = vadd.f32 %v1434_v60, %v1315_v57  ;;  %v1316_v63 = vadd.f32 %v1274_v54, %v1134_v58  ;;  %2124 = vmatpush1.bf16.msra.mxu0 %v1762_v56  ;;  %3018 = vmatpush1.bf16.msra.mxu1 %v1762_v56  ;;  %v2868_v17 = vpop.f32.mrb[39].mxu1  ;;  %v1449_v26 = vpop.permute.xlu1 %1448  ;;  %v1280_v60 = vld [vmem:[%s4269_s1 + $0x78] sm:$0xff] }
 0x13f   : > { %2125 = vmatprep.subr.bf16.mxu0 %v3277_v1  ;;  %3003 = vmatprep.subr.bf16.mxu1 %v3277_v1  ;;  %v3882_v29 = vpop.f32.mrb[40].mxu1 }
 0x140   : > { %v1610_v0 = vadd.f32 %v1439_v21, %v1316_v63  ;;  %v1651_v7 = vmax.f32 %v1609_v61, 0.0  ;;  %v2871_v32 = vpop.f32.mrb[41].mxu1 }
 0x141   : > { %v937_v4 = vpop.f32.mrb[20].mxu0  ;;  %v3888_v37 = vpop.f32.mrb[42].mxu1 }
 0x142   : > { %v1652_v8 = vmax.f32 %v1610_v0, 0.0  ;;  %v1139_v9 = vadd.f32 %v3806_v39, %v937_v4  ;;  %v939_v10 = vpop.f32.mrb[21].mxu0  ;;  %v3208_v39 = vld [vmem:[%s3817_s28 + $0x4] ss:$12 sps:$4 sm:$0xff]   ;;  %v2872_v41 = vpop.f32.mrb[43].mxu1 }
 0x143   : > { %v940_v13 = vpop.f32.mrb[22].mxu0  ;;  %2149 = vmatprep.mubr.bf16.mxu0 %v3208_v39 }
 0x144   : > { %v1763_v19 = vpack.c.bf16 %v1652_v8, %v1651_v7  ;;  %v1317_v20 = vadd.f32 %v1275_v5, %v1139_v9  ;;  %v1142_v12 = vadd.f32 %v3812_v47, %v940_v13  ;;  %v942_v22 = vpop.f32.mrb[23].mxu0  ;;  %v1277_v47 = vld [vmem:[%s4269_s1 + $0x60] sm:$0xff]  ;;  %v1464_v5 = vpop.permute.xlu0 %1463 }
 0x145   : > { %v1281_v13 = vld [vmem:[%s4269_s1 + $0x80] sm:$0xff] }
 0x146   : > { %v1611_v24 = vadd.f32 %v1444_v23, %v1317_v20  ;;  %v1318_v14 = vadd.f32 %v1276_v15, %v1142_v12  ;;  %2126 = vmatpush1.bf16.msra.mxu0 %v1763_v19  ;;  %3019 = vmatpush1.bf16.msra.mxu1 %v1763_v19  ;;  %v1282_v23 = vld [vmem:[%s4269_s1 + $0x88] sm:$0xff] }
 0x147   : > { %2127 = vmatprep.subr.bf16.mxu0 %v3277_v1  ;;  %3004 = vmatprep.subr.bf16.mxu1 %v3277_v1  ;;  %v3896_v50 = vpop.f32.mrb[44].mxu1 }
 0x148   : > { %v1612_v28 = vadd.f32 %v1449_v26, %v1318_v14  ;;  %v1653_v33 = vmax.f32 %v1611_v24, 0.0 }
 0x149   : > { %v945_v30 = vpop.f32.mrb[24].mxu0 }
 0x14a   : > { %v1654_v34 = vmax.f32 %v1612_v28, 0.0  ;;  %v1147_v35 = vadd.f32 %v3828_v62, %v945_v30  ;;  %v947_v36 = vpop.f32.mrb[25].mxu0  ;;  %v1459_v62 = vpop.permute.xlu1 %1458 }
 0x14b   : > { %v948_v38 = vpop.f32.mrb[26].mxu0  ;;  %v1474_v30 = vpop.permute.xlu0 %1473  ;;  %v1283_v36 = vld [vmem:[%s4269_s1 + $0x90] sm:$0xff] }
 0x14c   : > { %v1764_v42 = vpack.c.bf16 %v1654_v34, %v1653_v33  ;;  %v1319_v16 = vadd.f32 %v1277_v47, %v1147_v35  ;;  %v1150_v43 = vadd.f32 %v3831_v6, %v948_v38  ;;  %v950_v44 = vpop.f32.mrb[27].mxu0  ;;  %v2875_v6 = vpop.f32.mrb[45].mxu1 }
 0x14d   : > { %v3902_v58 = vpop.f32.mrb[46].mxu1  ;;  %v1284_v44 = vld [vmem:[%s4269_s1 + $0x98] sm:$0xff] }
 0x14e   : > { %v1613_v18 = vadd.f32 %v1454_v45, %v1319_v16  ;;  %v1320_v48 = vadd.f32 %v1278_v40, %v1150_v43  ;;  %2128 = vmatpush1.bf16.msra.mxu0 %v1764_v42  ;;  %3020 = vmatpush1.bf16.msra.mxu1 %v1764_v42  ;;  %v2876_v61 = vpop.f32.mrb[47].mxu1 }
 0x14f   : > { %2129 = vmatprep.subr.bf16.mxu0 %v3277_v1  ;;  %3005 = vmatprep.subr.bf16.mxu1 %v3277_v1  ;;  %v3910_v9 = vpop.f32.mrb[48].mxu1 }
 0x150   : > { %v1614_v49 = vadd.f32 %v1459_v62, %v1320_v48  ;;  %v1655_v54 = vmax.f32 %v1613_v18, 0.0 }
 0x151   : > { %v953_v51 = vpop.f32.mrb[28].mxu0 }
 0x152   : > { %v1656_v55 = vmax.f32 %v1614_v49, 0.0  ;;  %v1155_v56 = vadd.f32 %v3842_v25, %v953_v51  ;;  %v955_v57 = vpop.f32.mrb[29].mxu0  ;;  %v1469_v25 = vpop.permute.xlu1 %1468 }
 0x153   : > { %v956_v59 = vpop.f32.mrb[30].mxu0  ;;  %v1484_v51 = vpop.permute.xlu0 %1483  ;;  %v1285_v57 = vld [vmem:[%s4269_s1 + $0xa0] sm:$0xff] }
 0x154   : > { %v1765_v63 = vpack.c.bf16 %v1656_v55, %v1655_v54  ;;  %v1321_v21 = vadd.f32 %v1279_v53, %v1155_v56  ;;  %v1158_v0 = vadd.f32 %v3845_v31, %v956_v59  ;;  %v958_v4 = vpop.f32.mrb[31].mxu0  ;;  %v2879_v31 = vpop.f32.mrb[49].mxu1 }
 0x155   : > { %v3916_v12 = vpop.f32.mrb[50].mxu1  ;;  %v1286_v4 = vld [vmem:[%s4269_s1 + $0xa8] sm:$0xff] }
 0x156   : > { %v1615_v27 = vadd.f32 %v1464_v5, %v1321_v21  ;;  %v1322_v7 = vadd.f32 %v1280_v60, %v1158_v0  ;;  %2130 = vmatpush1.bf16.msra.mxu0 %v1765_v63  ;;  %3021 = vmatpush1.bf16.msra.mxu1 %v1765_v63  ;;  %v2880_v24 = vpop.f32.mrb[51].mxu1 }
 0x157   : > { %2131 = vmatprep.subr.bf16.mxu0 %v3277_v1  ;;  %3006 = vmatprep.subr.bf16.mxu1 %v3277_v1  ;;  %v3924_v34 = vpop.f32.mrb[52].mxu1 }
 0x158   : > { %v1616_v8 = vadd.f32 %v1469_v25, %v1322_v7  ;;  %v1657_v15 = vmax.f32 %v1615_v27, 0.0 }
 0x159   : > { %v961_v10 = vpop.f32.mrb[32].mxu0 }
 0x15a   : > { %v1658_v17 = vmax.f32 %v1616_v8, 0.0  ;;  %v1163_v19 = vadd.f32 %v3856_v46, %v961_v10  ;;  %v963_v20 = vpop.f32.mrb[33].mxu0  ;;  %v1479_v46 = vpop.permute.xlu1 %1478 }
 0x15b   : > { %v964_v22 = vpop.f32.mrb[34].mxu0  ;;  %v1494_v10 = vpop.permute.xlu0 %1493  ;;  %v1287_v20 = vld [vmem:[%s4269_s1 + $0xb0] sm:$0xff] }
 0x15c   : > { %v1766_v14 = vpack.c.bf16 %v1658_v17, %v1657_v15  ;;  %v1323_v39 = vadd.f32 %v1281_v13, %v1163_v19  ;;  %v1166_v26 = vadd.f32 %v3859_v52, %v964_v22  ;;  %v966_v28 = vpop.f32.mrb[35].mxu0  ;;  %v2883_v52 = vpop.f32.mrb[53].mxu1 }
 0x15d   : > { %v3930_v16 = vpop.f32.mrb[54].mxu1  ;;  %v1288_v28 = vld [vmem:[%s4269_s1 + $0xb8] sm:$0xff] }
 0x15e   : > { %v1617_v47 = vadd.f32 %v1474_v30, %v1323_v39  ;;  %v1324_v32 = vadd.f32 %v1282_v23, %v1166_v26  ;;  %2132 = vmatpush1.bf16.msra.mxu0 %v1766_v14  ;;  %3022 = vmatpush1.bf16.msra.mxu1 %v1766_v14  ;;  %v2884_v45 = vpop.f32.mrb[55].mxu1 }
 0x15f   : > { %2133 = vmatprep.subr.bf16.mxu0 %v3277_v1  ;;  %3007 = vmatprep.subr.bf16.mxu1 %v3277_v1  ;;  %v3938_v55 = vpop.f32.mrb[56].mxu1 }
 0x160   : > { %v1618_v33 = vadd.f32 %v1479_v46, %v1324_v32  ;;  %v1659_v38 = vmax.f32 %v1617_v47, 0.0 }
 0x161   : > { %v969_v35 = vpop.f32.mrb[36].mxu0 }
 0x162   : > { %v1660_v40 = vmax.f32 %v1618_v33, 0.0  ;;  %v1171_v41 = vadd.f32 %v3867_v2, %v969_v35  ;;  %v971_v42 = vpop.f32.mrb[37].mxu0  ;;  %v1489_v2 = vpop.permute.xlu1 %1488 }
 0x163   : > { %v972_v43 = vpop.f32.mrb[38].mxu0  ;;  %v1504_v35 = vpop.permute.xlu0 %1503  ;;  %v1289_v42 = vld [vmem:[%s4269_s1 + $0xc0] sm:$0xff] }
 0x164   : > { %v1767_v18 = vpack.c.bf16 %v1660_v40, %v1659_v38  ;;  %v1325_v48 = vadd.f32 %v1283_v36, %v1171_v41  ;;  %v1174_v62 = vadd.f32 %v3873_v11, %v972_v43  ;;  %v974_v49 = vpop.f32.mrb[39].mxu0  ;;  %v2887_v11 = vpop.f32.mrb[57].mxu1 }
 0x165   : > { %v3944_v21 = vpop.f32.mrb[58].mxu1  ;;  %v1290_v49 = vld [vmem:[%s4269_s1 + $0xc8] sm:$0xff] }
 0x166   : > { %v1619_v53 = vadd.f32 %v1484_v51, %v1325_v48  ;;  %v1326_v6 = vadd.f32 %v1284_v44, %v1174_v62  ;;  %2134 = vmatpush1.bf16.msra.mxu0 %v1767_v18  ;;  %3023 = vmatpush1.bf16.msra.mxu1 %v1767_v18  ;;  %v2888_v5 = vpop.f32.mrb[59].mxu1 }
 0x167   : > { %2135 = vmatprep.subr.bf16.mxu0 %v3277_v1  ;;  %3008 = vmatprep.subr.bf16.mxu1 %v3277_v1  ;;  %v3952_v17 = vpop.f32.mrb[60].mxu1 }
 0x168   : > { %v1620_v54 = vadd.f32 %v1489_v2, %v1326_v6  ;;  %v1661_v59 = vmax.f32 %v1619_v53, 0.0 }
 0x169   : > { %v977_v56 = vpop.f32.mrb[40].mxu0 }
 0x16a   : > { %v1662_v60 = vmax.f32 %v1620_v54, 0.0  ;;  %v1179_v61 = vadd.f32 %v3882_v29, %v977_v56  ;;  %v979_v63 = vpop.f32.mrb[41].mxu0  ;;  %v1499_v29 = vpop.permute.xlu1 %1498 }
 0x16b   : > { %v980_v0 = vpop.f32.mrb[42].mxu0  ;;  %v1514_v56 = vpop.permute.xlu0 %1513  ;;  %v1291_v63 = vld [vmem:[%s4269_s1 + $0xd0] sm:$0xff] }
 0x16c   : > { %v1768_v27 = vpack.c.bf16 %v1662_v60, %v1661_v59  ;;  %v1327_v7 = vadd.f32 %v1285_v57, %v1179_v61  ;;  %v1182_v25 = vadd.f32 %v3888_v37, %v980_v0  ;;  %v982_v8 = vpop.f32.mrb[43].mxu0  ;;  %v2891_v37 = vpop.f32.mrb[61].mxu1 }
 0x16d   : > { %v3958_v39 = vpop.f32.mrb[62].mxu1  ;;  %v1292_v8 = vld [vmem:[%s4269_s1 + $0xd8] sm:$0xff] }
 0x16e   : > { %v1621_v13 = vadd.f32 %v1494_v10, %v1327_v7  ;;  %v1328_v31 = vadd.f32 %v1286_v4, %v1182_v25  ;;  %2136 = vmatpush1.bf16.msra.mxu0 %v1768_v27  ;;  %3024 = vmatpush1.bf16.msra.mxu1 %v1768_v27  ;;  %v2892_v30 = vpop.f32.mrb[63].mxu1 }
 0x16f   : > { %2137 = vmatprep.subr.bf16.mxu0 %v3277_v1  ;;  %3009 = vmatprep.subr.bf16.mxu1 %v3277_v1  ;;  %v3966_v40 = vpop.f32.mrb[64].mxu1 }
 0x170   : > { %v1622_v15 = vadd.f32 %v1499_v29, %v1328_v31  ;;  %v1663_v22 = vmax.f32 %v1621_v13, 0.0 }
 0x171   : > { %v985_v19 = vpop.f32.mrb[44].mxu0 }
 0x172   : > { %v1664_v23 = vmax.f32 %v1622_v15, 0.0  ;;  %v1187_v24 = vadd.f32 %v3896_v50, %v985_v19  ;;  %v987_v14 = vpop.f32.mrb[45].mxu0  ;;  %v1509_v50 = vpop.permute.xlu1 %1508 }
 0x173   : > { %v988_v26 = vpop.f32.mrb[46].mxu0  ;;  %v1524_v19 = vpop.permute.xlu0 %1523  ;;  %v1293_v14 = vld [vmem:[%s4269_s1 + $0xe0] sm:$0xff] }
 0x174   : > { %v1769_v47 = vpack.c.bf16 %v1664_v23, %v1663_v22  ;;  %v1329_v32 = vadd.f32 %v1287_v20, %v1187_v24  ;;  %v1190_v46 = vadd.f32 %v3902_v58, %v988_v26  ;;  %v990_v33 = vpop.f32.mrb[47].mxu0  ;;  %v2895_v58 = vpop.f32.mrb[65].mxu1 }
 0x175   : > { %v3972_v48 = vpop.f32.mrb[66].mxu1  ;;  %v1294_v33 = vld [vmem:[%s4269_s1 + $0xe8] sm:$0xff] }
 0x176   : > { %v1623_v36 = vadd.f32 %v1504_v35, %v1329_v32  ;;  %v1330_v52 = vadd.f32 %v1288_v28, %v1190_v46  ;;  %2138 = vmatpush1.bf16.msra.mxu0 %v1769_v47  ;;  %3025 = vmatpush1.bf16.msra.mxu1 %v1769_v47  ;;  %v2896_v51 = vpop.f32.mrb[67].mxu1 }
 0x177   : > { %2139 = vmatprep.subr.bf16.mxu0 %v3277_v1  ;;  %3010 = vmatprep.subr.bf16.mxu1 %v3277_v1  ;;  %v3980_v60 = vpop.f32.mrb[68].mxu1 }
 0x178   : > { %v1624_v38 = vadd.f32 %v1509_v50, %v1330_v52  ;;  %v1665_v43 = vmax.f32 %v1623_v36, 0.0 }
 0x179   : > { %v993_v41 = vpop.f32.mrb[48].mxu0 }
 0x17a   : > { %v1666_v44 = vmax.f32 %v1624_v38, 0.0  ;;  %v1195_v45 = vadd.f32 %v3910_v9, %v993_v41  ;;  %v995_v18 = vpop.f32.mrb[49].mxu0  ;;  %v1519_v9 = vpop.permute.xlu1 %1518 }
 0x17b   : > { %v996_v62 = vpop.f32.mrb[50].mxu0  ;;  %v1534_v41 = vpop.permute.xlu0 %1533  ;;  %v1295_v18 = vld [vmem:[%s4269_s1 + $0xf0] sm:$0xff] }
 0x17c   : > { %v1770_v53 = vpack.c.bf16 %v1666_v44, %v1665_v43  ;;  %v1331_v6 = vadd.f32 %v1289_v42, %v1195_v45  ;;  %v1198_v2 = vadd.f32 %v3916_v12, %v996_v62  ;;  %v998_v54 = vpop.f32.mrb[51].mxu0  ;;  %v2899_v12 = vpop.f32.mrb[69].mxu1 }
 0x17d   : > { %v3986_v7 = vpop.f32.mrb[70].mxu1  ;;  %v1296_v54 = vld [vmem:[%s4269_s1 + $0xf8] sm:$0xff] }
 0x17e   : > { %v1625_v57 = vadd.f32 %v1514_v56, %v1331_v6  ;;  %v1332_v11 = vadd.f32 %v1290_v49, %v1198_v2  ;;  %2140 = vmatpush1.bf16.msra.mxu0 %v1770_v53  ;;  %3026 = vmatpush1.bf16.msra.mxu1 %v1770_v53  ;;  %v2900_v10 = vpop.f32.mrb[71].mxu1 }
 0x17f   : > { %2141 = vmatprep.subr.bf16.mxu0 %v3277_v1  ;;  %3011 = vmatprep.subr.bf16.mxu1 %v3277_v1  ;;  %v3994_v23 = vpop.f32.mrb[72].mxu1 }
 0x180   : > { %v1626_v59 = vadd.f32 %v1519_v9, %v1332_v11  ;;  %v1667_v0 = vmax.f32 %v1625_v57, 0.0 }
 0x181   : > { %v1001_v61 = vpop.f32.mrb[52].mxu0 }
 0x182   : > { %v1668_v4 = vmax.f32 %v1626_v59, 0.0  ;;  %v1203_v5 = vadd.f32 %v3924_v34, %v1001_v61  ;;  %v1003_v27 = vpop.f32.mrb[53].mxu0  ;;  %v1529_v34 = vpop.permute.xlu1 %1528 }
 0x183   : > { %v1004_v25 = vpop.f32.mrb[54].mxu0  ;;  %v1544_v61 = vpop.permute.xlu0 %1543 }
 0x184   : > { %v1771_v13 = vpack.c.bf16 %v1668_v4, %v1667_v0  ;;  %v1333_v31 = vadd.f32 %v1291_v63, %v1203_v5  ;;  %v1206_v29 = vadd.f32 %v3930_v16, %v1004_v25  ;;  %v1006_v15 = vpop.f32.mrb[55].mxu0  ;;  %v2903_v16 = vpop.f32.mrb[73].mxu1 }
 0x185   : > { %v4000_v32 = vpop.f32.mrb[74].mxu1 }
 0x186   : > { %v1627_v20 = vadd.f32 %v1524_v19, %v1333_v31  ;;  %v1334_v37 = vadd.f32 %v1292_v8, %v1206_v29  ;;  %2142 = vmatpush1.bf16.msra.mxu0 %v1771_v13  ;;  %3027 = vmatpush1.bf16.msra.mxu1 %v1771_v13  ;;  %v2904_v35 = vpop.f32.mrb[75].mxu1  ;;  %v1298_v29 = vld [vmem:[%s4269_s1 + $0x108] sm:$0xff] }
 0x187   : > { %2143 = vmatprep.subr.bf16.mxu0 %v3277_v1  ;;  %3012 = vmatprep.subr.bf16.mxu1 %v3277_v1  ;;  %v4008_v44 = vpop.f32.mrb[76].mxu1 }
 0x188   : > { %v1628_v22 = vadd.f32 %v1529_v34, %v1334_v37  ;;  %v1669_v26 = vmax.f32 %v1627_v20, 0.0 }
 0x189   : > { %v1009_v24 = vpop.f32.mrb[56].mxu0 }
 0x18a   : > { %v1670_v28 = vmax.f32 %v1628_v22, 0.0  ;;  %v1211_v30 = vadd.f32 %v3938_v55, %v1009_v24  ;;  %v1011_v47 = vpop.f32.mrb[57].mxu0  ;;  %v1539_v55 = vpop.permute.xlu1 %1538  ;;  %v3194_v24 = vld [vmem:[%s3817_s28 + $0x180] ss:$12 sps:$4 sm:$0xff]  }
 0x18b   : > { %v1012_v46 = vpop.f32.mrb[58].mxu0  ;;  %v1554_v22 = vpop.permute.xlu0 %1553 }
 0x18c   : > { %v1772_v36 = vpack.c.bf16 %v1670_v28, %v1669_v26  ;;  %v1335_v52 = vadd.f32 %v1293_v14, %v1211_v30  ;;  %v1214_v50 = vadd.f32 %v3944_v21, %v1012_v46  ;;  %v1014_v38 = vpop.f32.mrb[59].mxu0  ;;  %v2907_v21 = vpop.f32.mrb[77].mxu1  ;;  %v3206_v14 = vld [vmem:[%s3817_s28] ss:$12 sps:$4 sm:$0xff]   ;;  %v3197_v26 = vld [vmem:[%s3817_s28 + $0x19c] ss:$12 sps:$4 sm:$0xff]  }
 0x18d   : > { %v4014_v6 = vpop.f32.mrb[78].mxu1  ;;  %v3210_v28 = vld [vmem:[%s3817_s28 + $0x1c] ss:$12 sps:$4 sm:$0xff]   ;;  %v3212_v21 = vld [vmem:[%s3817_s28 + $0x18] ss:$12 sps:$4 sm:$0xff]  }
 0x18e   : > { %v1629_v42 = vadd.f32 %v1534_v41, %v1335_v52  ;;  %v1336_v58 = vadd.f32 %v1294_v33, %v1214_v50  ;;  %2144 = vmatpush1.bf16.msra.mxu0 %v1772_v36  ;;  %3028 = vmatpush1.bf16.msra.mxu1 %v1772_v36  ;;  %v2908_v56 = vpop.f32.mrb[79].mxu1  ;;  %v1300_v38 = vld [vmem:[%s4269_s1 + $0x118] sm:$0xff]  ;;  %v1757_v41 = vld [vmem:[%s3817_s28 + $0x1b0] sm:$0xff] }
 0x18f   : > { %2145 = vmatprep.subr.bf16.mxu0 %v3277_v1  ;;  %3013 = vmatprep.subr.bf16.mxu1 %v3277_v1  ;;  %v4022_v4 = vpop.f32.mrb[80].mxu1  ;;  %v1301_v56 = vld [vmem:[%s4269_s1 + $0x120] sm:$0xff] }
 0x190   : > { %v1630_v43 = vadd.f32 %v1539_v55, %v1336_v58  ;;  %v1671_v62 = vmax.f32 %v1629_v42, 0.0  ;;  %v2911_v27 = vpop.f32.mrb[81].mxu1 }
 0x191   : > { %v1017_v45 = vpop.f32.mrb[60].mxu0  ;;  %v4028_v31 = vpop.f32.mrb[82].mxu1  ;;  %v3216_v27 = vld [vmem:[%s3817_s28 + $0x30] ss:$12 sps:$4 sm:$0xff]  }
 0x192   : > { %v1672_v49 = vmax.f32 %v1630_v43, 0.0  ;;  %v1219_v51 = vadd.f32 %v3952_v17, %v1017_v45  ;;  %v1019_v53 = vpop.f32.mrb[61].mxu0  ;;  %v1549_v17 = vpop.permute.xlu1 %1548 }
 0x193   : > { %v1020_v2 = vpop.f32.mrb[62].mxu0  ;;  %v2912_v15 = vpop.f32.mrb[83].mxu1 }
 0x194   : > { %v1773_v57 = vpack.c.bf16 %v1672_v49, %v1671_v62  ;;  %v1337_v11 = vadd.f32 %v1295_v18, %v1219_v51  ;;  %v1222_v9 = vadd.f32 %v3958_v39, %v1020_v2  ;;  %v1022_v59 = vpop.f32.mrb[63].mxu0  ;;  %v1297_v39 = vld [vmem:[%s4269_s1 + $0x100] sm:$0xff]  ;;  %v1564_v45 = vpop.permute.xlu0 %1563  ;;  %v2746_v49 = vcombine.high %v1757_v41, %v1757_v41 }
 0x195   : > { %v3199_v18 = vld [vmem:[%s3817_s28 + $0x198] ss:$12 sps:$4 sm:$0xff]   ;;  %v3214_v51 = vld [vmem:[%s3817_s28 + $0x34] ss:$12 sps:$4 sm:$0xff]  }
 0x196   : > { %v1631_v63 = vadd.f32 %v1544_v61, %v1337_v11  ;;  %v1338_v12 = vadd.f32 %v1296_v54, %v1222_v9  ;;  %2146 = vmatpush1.bf16.msra.mxu0 %v1773_v57  ;;  %3029 = vmatpush1.bf16.msra.mxu1 %v1773_v57  ;;  %v1559_v30 = vpop.permute.xlu1 %1558  ;;  %v1302_v61 = vld [vmem:[%s4269_s1 + $0x128] sm:$0xff] }
 0x197   : > { %2147 = vmatprep.subr.bf16.mxu0 %v3277_v1  ;;  %3014 = vmatprep.subr.bf16.mxu1 %v3277_v1 }
 0x198   : > { %v1632_v0 = vadd.f32 %v1549_v17, %v1338_v12  ;;  %v1673_v25 = vmax.f32 %v1631_v63, 0.0 }
 0x199   : > { %v1025_v5 = vpop.f32.mrb[64].mxu0 }
 0x19a   : > { %v1674_v8 = vmax.f32 %v1632_v0, 0.0  ;;  %v1227_v10 = vadd.f32 %v3966_v40, %v1025_v5  ;;  %v1027_v13 = vpop.f32.mrb[65].mxu0  ;;  %v1569_v53 = vpop.permute.xlu1 %1568 }
 0x19b   : > { %v1028_v1 = vpop.f32.mrb[66].mxu0  ;;  %v1574_v5 = vpop.permute.xlu0 %1573 }
 0x19c   : > { %v1774_v19 = vpack.c.bf16 %v1674_v8, %v1673_v25  ;;  %v1339_v20 = vadd.f32 %v1297_v39, %v1227_v10  ;;  %v1230_v37 = vadd.f32 %v3972_v48, %v1028_v1  ;;  %v1030_v34 = vpop.f32.mrb[67].mxu0  ;;  %v1299_v48 = vld [vmem:[%s4269_s1 + $0x110] sm:$0xff]  ;;  %v2745_v39 = vcombine.low %v1757_v41, %v1757_v41 }
 0x19d   : > { %v1304_v34 = vld [vmem:[%s4269_s1 + $0x138] sm:$0xff] }
 0x19e   : > { %v1633_v40 = vadd.f32 %v1554_v22, %v1339_v20  ;;  %v1340_v16 = vadd.f32 %v1298_v29, %v1230_v37  ;;  %2148 = vmatpush1.bf16.msra.mxu0 %v1774_v19  ;;  %3030 = vmatpush1.bf16.msra.mxu1 %v1774_v19  ;;  %v1579_v10 = vpop.permute.xlu1 %1578  ;;  %v1303_v29 = vld [vmem:[%s4269_s1 + $0x130] sm:$0xff] }
 0x19f   : > { %2913 = vmatprep.subr.bf16.mxu1 %v3278_v3 }
 0x1a0   : > { %v1634_v47 = vadd.f32 %v1559_v30, %v1340_v16  ;;  %v1675_v33 = vmax.f32 %v1633_v40, 0.0  ;;  %v1584_v16 = vpop.permute.xlu0 %1583 }
 0x1a1   : > { %v1033_v46 = vpop.f32.mrb[68].mxu0  ;;  %2278 = vmatmul.mubr.bf16.vlgmr.msra.gmra.mrb[84].mxu1 %v3194_v24  ;;  %2150 = vmatmul.mubr.bf16.vlgmr.msra.gmra.mrb[84].mxu0 %v3206_v14 }
 0x1a2   : > { %v1676_v35 = vmax.f32 %v1634_v47, 0.0  ;;  %v1235_v36 = vadd.f32 %v3980_v60, %v1033_v46  ;;  %v1035_v52 = vpop.f32.mrb[69].mxu0  ;;  %2285 = vmatprep.mubr.bf16.mxu1 %v3197_v26  ;;  %2157 = vmatprep.mubr.bf16.mxu0 %v3210_v28  ;;  %v3220_v26 = vld [vmem:[%s3817_s28 + $0x48] ss:$12 sps:$4 sm:$0xff]   ;;  %v1589_v47 = vpop.permute.xlu1 %1588 }
 0x1a3   : > { %v1036_v50 = vpop.f32.mrb[70].mxu0 }
 0x1a4   : > { %v1775_v42 = vpack.c.bf16 %v1676_v35, %v1675_v33  ;;  %v1341_v58 = vadd.f32 %v1299_v48, %v1235_v36  ;;  %v1238_v55 = vadd.f32 %v3986_v7, %v1036_v50  ;;  %v1038_v43 = vpop.f32.mrb[71].mxu0  ;;  %v1305_v33 = vld [vmem:[%s4269_s1 + $0x140] sm:$0xff] }
 0x1a5   : > { %v1594_v43 = vpop.permute.xlu0 %1593 }
 0x1a6   : > { %v1635_v62 = vadd.f32 %v1564_v45, %v1341_v58  ;;  %v1342_v60 = vadd.f32 %v1300_v38, %v1238_v55  ;;  %2914 = vmatpush3.bf16.msra.mxu1 %v1775_v42  ;;  %v1306_v38 = vld [vmem:[%s4269_s1 + $0x148] sm:$0xff] }
 0x1a7   : > { %2915 = vmatprep.subr.bf16.mxu1 %v3278_v3  ;;  %v3224_v45 = vld [vmem:[%s3817_s28 + $0x60] ss:$12 sps:$4 sm:$0xff]  }
 0x1a8   : > { %v1636_v2 = vadd.f32 %v1569_v53, %v1342_v60  ;;  %v1677_v7 = vmax.f32 %v1635_v62, 0.0  ;;  %v1599_v62 = vpop.permute.xlu1 %1598  ;;  %v3202_v53 = vld [vmem:[%s3817_s28 + $0x8] ss:$12 sps:$4 sm:$0xff]  }
 0x1a9   : > { %v1041_v54 = vpop.f32.mrb[72].mxu0  ;;  %2286 = vmatmul.mubr.bf16.gmra.mrb[88].mxu1 %v3199_v18  ;;  %2158 = vmatmul.mubr.bf16.gmra.mrb[88].mxu0 %v3212_v21 }
 0x1aa   : > { %v1678_v57 = vmax.f32 %v1636_v2, 0.0  ;;  %v1243_v11 = vadd.f32 %v3994_v23, %v1041_v54  ;;  %v1043_v9 = vpop.f32.mrb[73].mxu0  ;;  %2293 = vmatprep.mubr.bf16.mxu1 %v2746_v49  ;;  %2165 = vmatprep.mubr.bf16.mxu0 %v3214_v51  ;;  %v3218_v23 = vld [vmem:[%s3817_s28 + $0x4c] ss:$12 sps:$4 sm:$0xff]   ;;  %v3230_v54 = vld [vmem:[%s3817_s28 + $0x94] ss:$12 sps:$4 sm:$0xff]  }
 0x1ab   : > { %v1044_v59 = vpop.f32.mrb[74].mxu0  ;;  %v3228_v2 = vld [vmem:[%s3817_s28 + $0x78] ss:$12 sps:$4 sm:$0xff]   ;;  %v3236_v9 = vld [vmem:[%s3817_s28 + $0xa8] ss:$12 sps:$4 sm:$0xff]  }
 0x1ac   : > { %v1776_v63 = vpack.c.bf16 %v1678_v57, %v1677_v7  ;;  %v1343_v12 = vadd.f32 %v1301_v56, %v1243_v11  ;;  %v1246_v17 = vadd.f32 %v4000_v32, %v1044_v59  ;;  %v1046_v0 = vpop.f32.mrb[75].mxu0  ;;  %v3203_v56 = vld [vmem:[%s3817_s28 + $0x20] ss:$12 sps:$4 sm:$0xff]   ;;  %v3232_v7 = vld [vmem:[%s3817_s28 + $0x90] ss:$12 sps:$4 sm:$0xff]  }
 0x1ad   : > { %v3234_v57 = vld [vmem:[%s3817_s28 + $0xac] ss:$12 sps:$4 sm:$0xff]   ;;  %v3238_v59 = vld [vmem:[%s3817_s28 + $0xc4] ss:$12 sps:$4 sm:$0xff]  }
 0x1ae   : > { %v1637_v25 = vadd.f32 %v1574_v5, %v1343_v12  ;;  %v1344_v8 = vadd.f32 %v1302_v61, %v1246_v17  ;;  %2916 = vmatpush3.bf16.msra.mxu1 %v1776_v63  ;;  %v3204_v11 = vld [vmem:[%s3817_s28 + $0x38] ss:$12 sps:$4 sm:$0xff]   ;;  %v3205_v61 = vld [vmem:[%s3817_s28 + $0x50] ss:$12 sps:$4 sm:$0xff]   ;;  %v3240_v63 = vld [vmem:[%s3817_s28 + $0xc0] ss:$12 sps:$4 sm:$0xff]  }
 0x1af   : > { %2917 = vmatprep.subr.bf16.mxu1 %v3278_v3  ;;  %v3242_v12 = vld [vmem:[%s3817_s28 + $0xdc] ss:$12 sps:$4 sm:$0xff]   ;;  %v3244_v0 = vld [vmem:[%s3817_s28 + $0xd8] ss:$12 sps:$4 sm:$0xff]   ;;  %v3246_v5 = vld [vmem:[%s3817_s28 + $0xf4] ss:$12 sps:$4 sm:$0xff]  }
 0x1b0   : > { %v1638_v13 = vadd.f32 %v1579_v10, %v1344_v8  ;;  %v1679_v32 = vmax.f32 %v1637_v25, 0.0  ;;  %v3209_v17 = vld [vmem:[%s3817_s28 + $0x68] ss:$12 sps:$4 sm:$0xff]   ;;  %v3250_v25 = vld [vmem:[%s3817_s28 + $0x10c] ss:$12 sps:$4 sm:$0xff]  }
 0x1b1   : > { %v1049_v1 = vpop.f32.mrb[76].mxu0  ;;  %2294 = vmatmul.mubr.bf16.gmra.mrb[92].mxu1 %v2745_v39  ;;  %2166 = vmatmul.mubr.bf16.gmra.mrb[92].mxu0 %v3216_v27  ;;  %v3213_v39 = vld [vmem:[%s3817_s28 + $0x80] ss:$12 sps:$4 sm:$0xff]   ;;  %v3248_v27 = vld [vmem:[%s3817_s28 + $0xf0] ss:$12 sps:$4 sm:$0xff]  }
 0x1b2   : > { %v1680_v15 = vmax.f32 %v1638_v13, 0.0  ;;  %v1251_v19 = vadd.f32 %v4008_v44, %v1049_v1  ;;  %v1051_v20 = vpop.f32.mrb[77].mxu0  ;;  %2923 = vmatprep.mubr.msk.bf16.mxu1 %vm3279_vm0, %v3278_v3  ;;  %2173 = vmatprep.mubr.bf16.mxu0 %v3218_v23  ;;  %v3222_v44 = vld [vmem:[%s3817_s28 + $0x64] ss:$12 sps:$4 sm:$0xff]   ;;  %v3252_v23 = vld [vmem:[%s3817_s28 + $0x108] ss:$12 sps:$4 sm:$0xff]  }
 0x1b3   : > { %v1052_v37 = vpop.f32.mrb[78].mxu0  ;;  %v3217_v8 = vld [vmem:[%s3817_s28 + $0x98] ss:$12 sps:$4 sm:$0xff]   ;;  %v3221_v13 = vld [vmem:[%s3817_s28 + $0xb0] ss:$12 sps:$4 sm:$0xff]  }
 0x1b4   : > { %v1777_v22 = vpack.c.bf16 %v1680_v15, %v1679_v32  ;;  %v1345_v24 = vadd.f32 %v1303_v29, %v1251_v19  ;;  %v1254_v14 = vadd.f32 %v4014_v6, %v1052_v37  ;;  %v1054_v40 = vpop.f32.mrb[79].mxu0  ;;  %v3254_v10 = vld [vmem:[%s3817_s28 + $0x124] ss:$12 sps:$4 sm:$0xff]   ;;  %v3256_v1 = vld [vmem:[%s3817_s28 + $0x120] ss:$12 sps:$4 sm:$0xff]  }
 0x1b5   : > { %v3258_v29 = vld [vmem:[%s3817_s28 + $0x13c] ss:$12 sps:$4 sm:$0xff]   ;;  %v3260_v15 = vld [vmem:[%s3817_s28 + $0x138] ss:$12 sps:$4 sm:$0xff]   ;;  %v3262_v19 = vld [vmem:[%s3817_s28 + $0x154] ss:$12 sps:$4 sm:$0xff]  }
 0x1b6   : > { %v1639_v28 = vadd.f32 %v1584_v16, %v1345_v24  ;;  %v1346_v30 = vadd.f32 %v1304_v34, %v1254_v14  ;;  %2918 = vmatpush3.bf16.msra.mxu1 %v1777_v22  ;;  %v3225_v32 = vld [vmem:[%s3817_s28 + $0xc8] ss:$12 sps:$4 sm:$0xff]   ;;  %v3229_v20 = vld [vmem:[%s3817_s28 + $0xe0] ss:$12 sps:$4 sm:$0xff]   ;;  %v3264_v37 = vld [vmem:[%s3817_s28 + $0x150] ss:$12 sps:$4 sm:$0xff]  }
 0x1b7   : > { %2919 = vmatprep.subr.bf16.mxu1 %v3278_v3  ;;  %v3266_v34 = vld [vmem:[%s3817_s28 + $0x16c] ss:$12 sps:$4 sm:$0xff]   ;;  %v3268_v24 = vld [vmem:[%s3817_s28 + $0x168] ss:$12 sps:$4 sm:$0xff]   ;;  %v3237_v14 = vld [vmem:[%s3817_s28 + $0x110] ss:$12 sps:$4 sm:$0xff]  }
 0x1b8   : > { %v1640_v46 = vadd.f32 %v1589_v47, %v1346_v30  ;;  %v1681_v35 = vmax.f32 %v1639_v28, 0.0  ;;  %v3233_v22 = vld [vmem:[%s3817_s28 + $0xf8] ss:$12 sps:$4 sm:$0xff]   ;;  %v3241_v40 = vld [vmem:[%s3817_s28 + $0x128] ss:$12 sps:$4 sm:$0xff]  }
 0x1b9   : > { %v1057_v48 = vpop.f32.mrb[80].mxu0  ;;  %2174 = vmatmul.mubr.bf16.gmra.mrb[96].mxu0 %v3220_v26  ;;  %v3245_v16 = vld [vmem:[%s3817_s28 + $0x140] ss:$12 sps:$4 sm:$0xff]   ;;  %v3249_v26 = vld [vmem:[%s3817_s28 + $0x158] ss:$12 sps:$4 sm:$0xff]  }
 0x1ba   : > { %v1682_v6 = vmax.f32 %v1640_v46, 0.0  ;;  %v1259_v36 = vadd.f32 %v4022_v4, %v1057_v48  ;;  %v1059_v52 = vpop.f32.mrb[81].mxu0  ;;  %2181 = vmatprep.mubr.bf16.mxu0 %v3222_v44  ;;  %v3226_v4 = vld [vmem:[%s3817_s28 + $0x7c] ss:$12 sps:$4 sm:$0xff]   ;;  %v3261_v44 = vld [vmem:[%s3817_s28 + $0x1a0] ss:$12 sps:$4 sm:$0xff]  }
 0x1bb   : > { %v1060_v50 = vpop.f32.mrb[82].mxu0  ;;  %v3253_v28 = vld [vmem:[%s3817_s28 + $0x170] ss:$12 sps:$4 sm:$0xff]   ;;  %v3257_v30 = vld [vmem:[%s3817_s28 + $0x188] ss:$12 sps:$4 sm:$0xff]  }
 0x1bc   : > { %v1778_v41 = vpack.c.bf16 %v1682_v6, %v1681_v35  ;;  %v1347_v42 = vadd.f32 %v1305_v33, %v1259_v36  ;;  %v1262_v58 = vadd.f32 %v4028_v31, %v1060_v50  ;;  %v1062_v55 = vpop.f32.mrb[83].mxu0  ;;  %v3265_v47 = vld [vmem:[%s3817_s28 + $0x1b8] ss:$0 sps:$4 sm:$0xff]   ;;  %s2585_s28 = sshll.u32 %s4275_s21, 3 }
 0x1bd   : > { %s4186_s20 = scalar_lea.vmem %s4273_s5, %s2585_s28 }
 0x1be   : > { %v1641_v18 = vadd.f32 %v1594_v43, %v1347_v42  ;;  %v1348_v21 = vadd.f32 %v1306_v38, %v1262_v58  ;;  %2920 = vmatpush3.bf16.msra.mxu1 %v1778_v41 }
 0x1bf   : > { %2921 = vmatprep.subr.bf16.mxu1 %v3278_v3 }
 0x1c0   : > { %v1642_v60 = vadd.f32 %v1599_v62, %v1348_v21  ;;  %v1683_v49 = vmax.f32 %v1641_v18, 0.0 }
 0x1c1   : > { %2182 = vmatmul.mubr.bf16.gmra.mrb[100].mxu0 %v3224_v45 }
 0x1c2   : > { %v1684_v31 = vmax.f32 %v1642_v60, 0.0  ;;  %2189 = vmatprep.mubr.bf16.mxu0 %v3226_v4 }
 0x1c4   : > { %v1779_v51 = vpack.c.bf16 %v1684_v31, %v1683_v49 }
 0x1c6   : > { %2922 = vmatpush3.bf16.msra.mxu1 %v1779_v51 }
 0x1c9   : > { %2924 = vmatmul.mubr.msk.bf16.vlgmr.msra.gmra.mrb[96].mxu1 %vm799_vm1, %v3202_v53  ;;  %2190 = vmatmul.mubr.bf16.gmra.mrb[104].mxu0 %v3228_v2 }
 0x1ca   : > { %2927 = vmatprep.mubr.msk.bf16.mxu1 %vm3279_vm0, %v3278_v3  ;;  %2197 = vmatprep.mubr.bf16.mxu0 %v3230_v54 }
 0x1d1   : > { %2928 = vmatmul.mubr.msk.bf16.gmra.mrb[100].mxu1 %vm799_vm1, %v3203_v56  ;;  %2198 = vmatmul.mubr.bf16.gmra.mrb[108].mxu0 %v3232_v7 }
 0x1d2   : > { %2931 = vmatprep.mubr.msk.bf16.mxu1 %vm3279_vm0, %v3278_v3  ;;  %2205 = vmatprep.mubr.bf16.mxu0 %v3234_v57 }
 0x1d9   : > { %2932 = vmatmul.mubr.msk.bf16.gmra.mrb[104].mxu1 %vm799_vm1, %v3204_v11  ;;  %2206 = vmatmul.mubr.bf16.gmra.mrb[112].mxu0 %v3236_v9 }
 0x1da   : > { %2935 = vmatprep.mubr.msk.bf16.mxu1 %vm3279_vm0, %v3278_v3  ;;  %2213 = vmatprep.mubr.bf16.mxu0 %v3238_v59 }
 0x1e1   : > { %2936 = vmatmul.mubr.msk.bf16.gmra.mrb[108].mxu1 %vm799_vm1, %v3205_v61  ;;  %2214 = vmatmul.mubr.bf16.gmra.mrb[116].mxu0 %v3240_v63 }
 0x1e2   : > { %2939 = vmatprep.mubr.msk.bf16.mxu1 %vm3279_vm0, %v3278_v3  ;;  %2221 = vmatprep.mubr.bf16.mxu0 %v3242_v12 }
 0x1e9   : > { %2940 = vmatmul.mubr.msk.bf16.gmra.mrb[112].mxu1 %vm799_vm1, %v3209_v17  ;;  %2222 = vmatmul.mubr.bf16.gmra.mrb[120].mxu0 %v3244_v0 }
 0x1ea   : > { %2943 = vmatprep.mubr.msk.bf16.mxu1 %vm3279_vm0, %v3278_v3  ;;  %2229 = vmatprep.mubr.bf16.mxu0 %v3246_v5 }
 0x1f1   : > { %2944 = vmatmul.mubr.msk.bf16.gmra.mrb[116].mxu1 %vm799_vm1, %v3213_v39  ;;  %2230 = vmatmul.mubr.bf16.gmra.mrb[124].mxu0 %v3248_v27 }
 0x1f2   : > { %2947 = vmatprep.mubr.msk.bf16.mxu1 %vm3279_vm0, %v3278_v3  ;;  %2237 = vmatprep.mubr.bf16.mxu0 %v3250_v25 }
 0x1f9   : > { %2948 = vmatmul.mubr.msk.bf16.gmra.mrb[120].mxu1 %vm799_vm1, %v3217_v8  ;;  %2238 = vmatmul.mubr.bf16.gmra.mrb[128].mxu0 %v3252_v23 }
 0x1fa   : > { %2951 = vmatprep.mubr.msk.bf16.mxu1 %vm3279_vm0, %v3278_v3  ;;  %2245 = vmatprep.mubr.bf16.mxu0 %v3254_v10 }
 0x201   : > { %2952 = vmatmul.mubr.msk.bf16.gmra.mrb[124].mxu1 %vm799_vm1, %v3221_v13  ;;  %2246 = vmatmul.mubr.bf16.gmra.mrb[132].mxu0 %v3256_v1 }
 0x202   : > { %2955 = vmatprep.mubr.msk.bf16.mxu1 %vm3279_vm0, %v3278_v3  ;;  %2253 = vmatprep.mubr.bf16.mxu0 %v3258_v29 }
 0x209   : > { %2956 = vmatmul.mubr.msk.bf16.gmra.mrb[128].mxu1 %vm799_vm1, %v3225_v32  ;;  %2254 = vmatmul.mubr.bf16.gmra.mrb[136].mxu0 %v3260_v15 }
 0x20a   : > { %2959 = vmatprep.mubr.msk.bf16.mxu1 %vm3279_vm0, %v3278_v3  ;;  %2261 = vmatprep.mubr.bf16.mxu0 %v3262_v19 }
 0x211   : > { %2960 = vmatmul.mubr.msk.bf16.gmra.mrb[132].mxu1 %vm799_vm1, %v3229_v20  ;;  %2262 = vmatmul.mubr.bf16.gmra.mrb[140].mxu0 %v3264_v37 }
 0x212   : > { %2963 = vmatprep.mubr.msk.bf16.mxu1 %vm3279_vm0, %v3278_v3  ;;  %2269 = vmatprep.mubr.bf16.mxu0 %v3266_v34 }
 0x219   : > { %2964 = vmatmul.mubr.msk.bf16.gmra.mrb[136].mxu1 %vm799_vm1, %v3233_v22  ;;  %2270 = vmatmul.mubr.bf16.gmra.mrb[144].mxu0 %v3268_v24 }
 0x21a   : > { %2967 = vmatprep.mubr.msk.bf16.mxu1 %vm3279_vm0, %v3278_v3 }
 0x221   : > { %2968 = vmatmul.mubr.msk.bf16.gmra.mrb[140].mxu1 %vm799_vm1, %v3237_v14 }
 0x222   : > { %2971 = vmatprep.mubr.msk.bf16.mxu1 %vm3279_vm0, %v3278_v3 }
 0x229   : > { %2972 = vmatmul.mubr.msk.bf16.gmra.mrb[144].mxu1 %vm799_vm1, %v3241_v40 }
 0x22a   : > { %2975 = vmatprep.mubr.msk.bf16.mxu1 %vm3279_vm0, %v3278_v3 }
 0x231   : > { %2976 = vmatmul.mubr.msk.bf16.gmra.mrb[148].mxu1 %vm799_vm1, %v3245_v16 }
 0x232   : > { %2979 = vmatprep.mubr.msk.bf16.mxu1 %vm3279_vm0, %v3278_v3 }
 0x239   : > { %2980 = vmatmul.mubr.msk.bf16.gmra.mrb[152].mxu1 %vm799_vm1, %v3249_v26 }
 0x23a   : > { %2983 = vmatprep.mubr.msk.bf16.mxu1 %vm3279_vm0, %v3278_v3 }
 0x241   : > { %2984 = vmatmul.mubr.msk.bf16.gmra.mrb[156].mxu1 %vm799_vm1, %v3253_v28 }
 0x242   : > { %2987 = vmatprep.mubr.msk.bf16.mxu1 %vm3279_vm0, %v3278_v3 }
 0x249   : > { %2988 = vmatmul.mubr.msk.bf16.gmra.mrb[84].mxu1 %vm799_vm1, %v3257_v30 }
 0x24a   : > { %2991 = vmatprep.mubr.msk.bf16.mxu1 %vm3279_vm0, %v3278_v3 }
 0x251   : > { %2992 = vmatmul.mubr.msk.bf16.gmra.mrb[88].mxu1 %vm799_vm1, %v3261_v44 }
 0x252   : > { %2995 = vmatprep.mubr.msk.bf16.mxu1 %vm3279_vm0, %v3278_v3 }
 0x259   : > { %2996 = vmatmul.mubr.msk.bf16.gmra.mrb[92].mxu1 %vm799_vm1, %v3265_v47 }
 0x274   : > { %v2151_v46 = vpop.f32.mrb[84].mxu0 }
 0x275   : > { %v2153_v48 = vpop.f32.mrb[85].mxu0 }
 0x276   : > { %v2154_v33 = vpop.f32.mrb[86].mxu0 }
 0x277   : > { %v2156_v35 = vpop.f32.mrb[87].mxu0 }
 0x27c   : > { %v2159_v6 = vpop.f32.mrb[88].mxu0 }
 0x27d   : > { %v2161_v36 = vpop.f32.mrb[89].mxu0 }
 0x27e   : > { %v2162_v52 = vpop.f32.mrb[90].mxu0 }
 0x27f   : > { %v2164_v50 = vpop.f32.mrb[91].mxu0 }
 0x284   : > { %v2167_v38 = vpop.f32.mrb[92].mxu0 }
 0x285   : > { %v2169_v41 = vpop.f32.mrb[93].mxu0 }
 0x286   : > { %v2170_v42 = vpop.f32.mrb[94].mxu0 }
 0x287   : > { %v2172_v58 = vpop.f32.mrb[95].mxu0 }
 0x28c   : > { %v2175_v55 = vpop.f32.mrb[96].mxu0 }
 0x28d   : > { %v2177_v43 = vpop.f32.mrb[97].mxu0 }
 0x28e   : > { %v2178_v45 = vpop.f32.mrb[98].mxu0 }
 0x28f   : > { %v2180_v3 = vpop.f32.mrb[99].mxu0 }
 0x294   : > { %v2183_v18 = vpop.f32.mrb[100].mxu0 }
 0x295   : > { %v2185_v21 = vpop.f32.mrb[101].mxu0 }
 0x296   : > { %v2186_v4 = vpop.f32.mrb[102].mxu0 }
 0x297   : > { %v2188_v62 = vpop.f32.mrb[103].mxu0 }
 0x29c   : > { %v2335_v60 = vpop.f32.mrb[96].mxu1  ;;  %v2191_v49 = vpop.f32.mrb[104].mxu0 }
 0x29d   : > { %v2336_v31 = vadd.f32 %v2335_v60, %v2151_v46  ;;  %v2925_v51 = vpop.f32.mrb[97].mxu1  ;;  %v2193_v53 = vpop.f32.mrb[105].mxu0 }
 0x29e   : > { %v2338_v2 = vpop.f32.mrb[98].mxu1  ;;  %v2194_v54 = vpop.f32.mrb[106].mxu0 }
 0x29f   : > { %2486 = vst.msk [vmem:[%s4186_s20] sm:$0xff] %vm2485_vm2, %v2336_v31  ;;  %v2339_v56 = vadd.f32 %v2338_v2, %v2154_v33  ;;  %v2926_v7 = vpop.f32.mrb[99].mxu1  ;;  %v2196_v57 = vpop.f32.mrb[107].mxu0 }
 0x2a1   : > { %2487 = vst.msk [vmem:[%s4186_s20 + $0x8] sm:$0xff] %vm2485_vm2, %v2339_v56 }
 0x2a4   : > { %v2343_v11 = vpop.f32.mrb[100].mxu1  ;;  %v2199_v9 = vpop.f32.mrb[108].mxu0 }
 0x2a5   : > { %v2344_v59 = vadd.f32 %v2343_v11, %v2159_v6  ;;  %v2929_v61 = vpop.f32.mrb[101].mxu1  ;;  %v2201_v63 = vpop.f32.mrb[109].mxu0 }
 0x2a6   : > { %v2346_v12 = vpop.f32.mrb[102].mxu1  ;;  %v2202_v17 = vpop.f32.mrb[110].mxu0 }
 0x2a7   : > { %2488 = vst.msk [vmem:[%s4186_s20 + $0x10] sm:$0xff] %vm2485_vm2, %v2344_v59  ;;  %v2347_v0 = vadd.f32 %v2346_v12, %v2162_v52  ;;  %v2930_v5 = vpop.f32.mrb[103].mxu1  ;;  %v2204_v39 = vpop.f32.mrb[111].mxu0 }
 0x2a9   : > { %2489 = vst.msk [vmem:[%s4186_s20 + $0x18] sm:$0xff] %vm2485_vm2, %v2347_v0 }
 0x2ac   : > { %v2351_v27 = vpop.f32.mrb[104].mxu1  ;;  %v2207_v25 = vpop.f32.mrb[112].mxu0 }
 0x2ad   : > { %v2352_v8 = vadd.f32 %v2351_v27, %v2167_v38  ;;  %v2933_v23 = vpop.f32.mrb[105].mxu1  ;;  %v2209_v10 = vpop.f32.mrb[113].mxu0 }
 0x2ae   : > { %v2354_v13 = vpop.f32.mrb[106].mxu1  ;;  %v2210_v1 = vpop.f32.mrb[114].mxu0 }
 0x2af   : > { %2490 = vst.msk [vmem:[%s4186_s20 + $0x20] sm:$0xff] %vm2485_vm2, %v2352_v8  ;;  %v2355_v29 = vadd.f32 %v2354_v13, %v2170_v42  ;;  %v2934_v32 = vpop.f32.mrb[107].mxu1  ;;  %v2212_v15 = vpop.f32.mrb[115].mxu0 }
 0x2b1   : > { %2491 = vst.msk [vmem:[%s4186_s20 + $0x28] sm:$0xff] %vm2485_vm2, %v2355_v29 }
 0x2b4   : > { %v2359_v19 = vpop.f32.mrb[108].mxu1  ;;  %v2215_v20 = vpop.f32.mrb[116].mxu0 }
 0x2b5   : > { %v2360_v37 = vadd.f32 %v2359_v19, %v2175_v55  ;;  %v2937_v34 = vpop.f32.mrb[109].mxu1  ;;  %v2217_v22 = vpop.f32.mrb[117].mxu0 }
 0x2b6   : > { %v2362_v24 = vpop.f32.mrb[110].mxu1  ;;  %v2218_v14 = vpop.f32.mrb[118].mxu0 }
 0x2b7   : > { %2492 = vst.msk [vmem:[%s4186_s20 + $0x30] sm:$0xff] %vm2485_vm2, %v2360_v37  ;;  %v2363_v40 = vadd.f32 %v2362_v24, %v2178_v45  ;;  %v2938_v16 = vpop.f32.mrb[111].mxu1  ;;  %v2220_v26 = vpop.f32.mrb[119].mxu0 }
 0x2b9   : > { %2493 = vst.msk [vmem:[%s4186_s20 + $0x38] sm:$0xff] %vm2485_vm2, %v2363_v40 }
 0x2bc   : > { %v2367_v28 = vpop.f32.mrb[112].mxu1  ;;  %v2223_v30 = vpop.f32.mrb[120].mxu0 }
 0x2bd   : > { %v2368_v44 = vadd.f32 %v2367_v28, %v2183_v18  ;;  %v2941_v47 = vpop.f32.mrb[113].mxu1  ;;  %v2225_v46 = vpop.f32.mrb[121].mxu0 }
 0x2be   : > { %v2370_v48 = vpop.f32.mrb[114].mxu1  ;;  %v2226_v33 = vpop.f32.mrb[122].mxu0 }
 0x2bf   : > { %2494 = vst.msk [vmem:[%s4186_s20 + $0x40] sm:$0xff] %vm2485_vm2, %v2368_v44  ;;  %v2371_v35 = vadd.f32 %v2370_v48, %v2186_v4  ;;  %v2942_v6 = vpop.f32.mrb[115].mxu1  ;;  %v2228_v36 = vpop.f32.mrb[123].mxu0 }
 0x2c1   : > { %2495 = vst.msk [vmem:[%s4186_s20 + $0x48] sm:$0xff] %vm2485_vm2, %v2371_v35 }
 0x2c4   : > { %v2375_v52 = vpop.f32.mrb[116].mxu1  ;;  %v2231_v50 = vpop.f32.mrb[124].mxu0 }
 0x2c5   : > { %v2376_v38 = vadd.f32 %v2375_v52, %v2191_v49  ;;  %v2945_v41 = vpop.f32.mrb[117].mxu1  ;;  %v2233_v42 = vpop.f32.mrb[125].mxu0 }
 0x2c6   : > { %v2378_v58 = vpop.f32.mrb[118].mxu1  ;;  %v4208_v55 = vpop.f32.mrb[126].mxu0 }
 0x2c7   : > { %2496 = vst.msk [vmem:[%s4186_s20 + $0x50] sm:$0xff] %vm2485_vm2, %v2376_v38  ;;  %v2379_v43 = vadd.f32 %v2378_v58, %v2194_v54  ;;  %v2946_v45 = vpop.f32.mrb[119].mxu1  ;;  %v2236_v3 = vpop.f32.mrb[127].mxu0 }
 0x2c9   : > { %2497 = vst.msk [vmem:[%s4186_s20 + $0x58] sm:$0xff] %vm2485_vm2, %v2379_v43 }
 0x2cc   : > { %v2383_v18 = vpop.f32.mrb[120].mxu1  ;;  %v2239_v21 = vpop.f32.mrb[128].mxu0 }
 0x2cd   : > { %v2384_v4 = vadd.f32 %v2383_v18, %v2199_v9  ;;  %v2949_v62 = vpop.f32.mrb[121].mxu1  ;;  %v2241_v60 = vpop.f32.mrb[129].mxu0 }
 0x2ce   : > { %v2386_v49 = vpop.f32.mrb[122].mxu1  ;;  %v2242_v31 = vpop.f32.mrb[130].mxu0 }
 0x2cf   : > { %2498 = vst.msk [vmem:[%s4186_s20 + $0x60] sm:$0xff] %vm2485_vm2, %v2384_v4  ;;  %v2387_v51 = vadd.f32 %v2386_v49, %v2202_v17  ;;  %v2950_v53 = vpop.f32.mrb[123].mxu1  ;;  %v2244_v2 = vpop.f32.mrb[131].mxu0 }
 0x2d1   : > { %2499 = vst.msk [vmem:[%s4186_s20 + $0x68] sm:$0xff] %vm2485_vm2, %v2387_v51 }
 0x2d4   : > { %v2391_v54 = vpop.f32.mrb[124].mxu1  ;;  %v2247_v56 = vpop.f32.mrb[132].mxu0 }
 0x2d5   : > { %v2392_v7 = vadd.f32 %v2391_v54, %v2207_v25  ;;  %v2953_v57 = vpop.f32.mrb[125].mxu1  ;;  %v2249_v11 = vpop.f32.mrb[133].mxu0 }
 0x2d6   : > { %v2394_v9 = vpop.f32.mrb[126].mxu1  ;;  %v2250_v59 = vpop.f32.mrb[134].mxu0 }
 0x2d7   : > { %2500 = vst.msk [vmem:[%s4186_s20 + $0x70] sm:$0xff] %vm2485_vm2, %v2392_v7  ;;  %v2395_v61 = vadd.f32 %v2394_v9, %v2210_v1  ;;  %v2954_v63 = vpop.f32.mrb[127].mxu1  ;;  %v2252_v12 = vpop.f32.mrb[135].mxu0 }
 0x2d9   : > { %2501 = vst.msk [vmem:[%s4186_s20 + $0x78] sm:$0xff] %vm2485_vm2, %v2395_v61 }
 0x2dc   : > { %v2399_v17 = vpop.f32.mrb[128].mxu1  ;;  %v2255_v0 = vpop.f32.mrb[136].mxu0 }
 0x2dd   : > { %v2400_v5 = vadd.f32 %v2399_v17, %v2215_v20  ;;  %v2957_v39 = vpop.f32.mrb[129].mxu1  ;;  %v2257_v27 = vpop.f32.mrb[137].mxu0 }
 0x2de   : > { %v2402_v25 = vpop.f32.mrb[130].mxu1  ;;  %v2258_v8 = vpop.f32.mrb[138].mxu0 }
 0x2df   : > { %2502 = vst.msk [vmem:[%s4186_s20 + $0x80] sm:$0xff] %vm2485_vm2, %v2400_v5  ;;  %v2403_v23 = vadd.f32 %v2402_v25, %v2218_v14  ;;  %v2958_v10 = vpop.f32.mrb[131].mxu1  ;;  %v2260_v13 = vpop.f32.mrb[139].mxu0 }
 0x2e1   : > { %2503 = vst.msk [vmem:[%s4186_s20 + $0x88] sm:$0xff] %vm2485_vm2, %v2403_v23 }
 0x2e4   : > { %v2407_v1 = vpop.f32.mrb[132].mxu1  ;;  %v2263_v29 = vpop.f32.mrb[140].mxu0 }
 0x2e5   : > { %v2408_v32 = vadd.f32 %v2407_v1, %v2223_v30  ;;  %v2961_v15 = vpop.f32.mrb[133].mxu1  ;;  %v2265_v19 = vpop.f32.mrb[141].mxu0 }
 0x2e6   : > { %v2410_v20 = vpop.f32.mrb[134].mxu1  ;;  %v2266_v37 = vpop.f32.mrb[142].mxu0 }
 0x2e7   : > { %2504 = vst.msk [vmem:[%s4186_s20 + $0x90] sm:$0xff] %vm2485_vm2, %v2408_v32  ;;  %v2411_v34 = vadd.f32 %v2410_v20, %v2226_v33  ;;  %v2962_v22 = vpop.f32.mrb[135].mxu1  ;;  %v2268_v24 = vpop.f32.mrb[143].mxu0 }
 0x2e9   : > { %2505 = vst.msk [vmem:[%s4186_s20 + $0x98] sm:$0xff] %vm2485_vm2, %v2411_v34 }
 0x2ec   : > { %v2415_v14 = vpop.f32.mrb[136].mxu1  ;;  %v2271_v40 = vpop.f32.mrb[144].mxu0 }
 0x2ed   : > { %v2965_v16 = vpop.f32.mrb[137].mxu1  ;;  %v2416_v26 = vadd.f32 %v2415_v14, %v2231_v50  ;;  %v2273_v28 = vpop.f32.mrb[145].mxu0 }
 0x2ee   : > { %v2418_v30 = vpop.f32.mrb[138].mxu1  ;;  %v2274_v44 = vpop.f32.mrb[146].mxu0 }
 0x2ef   : > { %2506 = vst.msk [vmem:[%s4186_s20 + $0xa0] sm:$0xff] %vm2485_vm2, %v2416_v26  ;;  %v2966_v47 = vpop.f32.mrb[139].mxu1  ;;  %v2419_v46 = vadd.f32 %v2418_v30, %v4208_v55  ;;  %v2276_v48 = vpop.f32.mrb[147].mxu0 }
 0x2f1   : > { %2507 = vst.msk [vmem:[%s4186_s20 + $0xa8] sm:$0xff] %vm2485_vm2, %v2419_v46 }
 0x2f4   : > { %v2423_v33 = vpop.f32.mrb[140].mxu1 }
 0x2f5   : > { %v2969_v35 = vpop.f32.mrb[141].mxu1  ;;  %v2424_v6 = vadd.f32 %v2423_v33, %v2239_v21 }
 0x2f6   : > { %v2426_v36 = vpop.f32.mrb[142].mxu1 }
 0x2f7   : > { %v2970_v52 = vpop.f32.mrb[143].mxu1  ;;  %2508 = vst.msk [vmem:[%s4186_s20 + $0xb0] sm:$0xff] %vm2485_vm2, %v2424_v6  ;;  %v2427_v50 = vadd.f32 %v2426_v36, %v2242_v31 }
 0x2f9   : > { %2509 = vst.msk [vmem:[%s4186_s20 + $0xb8] sm:$0xff] %vm2485_vm2, %v2427_v50 }
 0x2fc   : > { %v2431_v38 = vpop.f32.mrb[144].mxu1 }
 0x2fd   : > { %v2973_v41 = vpop.f32.mrb[145].mxu1  ;;  %v2432_v42 = vadd.f32 %v2431_v38, %v2247_v56 }
 0x2fe   : > { %v2434_v58 = vpop.f32.mrb[146].mxu1 }
 0x2ff   : > { %v2974_v55 = vpop.f32.mrb[147].mxu1  ;;  %2510 = vst.msk [vmem:[%s4186_s20 + $0xc0] sm:$0xff] %vm2485_vm2, %v2432_v42  ;;  %v2435_v43 = vadd.f32 %v2434_v58, %v2250_v59 }
 0x301   : > { %2511 = vst.msk [vmem:[%s4186_s20 + $0xc8] sm:$0xff] %vm2485_vm2, %v2435_v43 }
 0x304   : > { %v2439_v45 = vpop.f32.mrb[148].mxu1 }
 0x305   : > { %v2977_v3 = vpop.f32.mrb[149].mxu1  ;;  %v2440_v18 = vadd.f32 %v2439_v45, %v2255_v0 }
 0x306   : > { %v2442_v21 = vpop.f32.mrb[150].mxu1 }
 0x307   : > { %v2978_v4 = vpop.f32.mrb[151].mxu1  ;;  %2512 = vst.msk [vmem:[%s4186_s20 + $0xd0] sm:$0xff] %vm2485_vm2, %v2440_v18  ;;  %v2443_v62 = vadd.f32 %v2442_v21, %v2258_v8 }
 0x309   : > { %2513 = vst.msk [vmem:[%s4186_s20 + $0xd8] sm:$0xff] %vm2485_vm2, %v2443_v62 }
 0x30c   : > { %v2447_v60 = vpop.f32.mrb[152].mxu1 }
 0x30d   : > { %v2981_v49 = vpop.f32.mrb[153].mxu1  ;;  %v2448_v31 = vadd.f32 %v2447_v60, %v2263_v29 }
 0x30e   : > { %v2450_v51 = vpop.f32.mrb[154].mxu1 }
 0x30f   : > { %v2982_v53 = vpop.f32.mrb[155].mxu1  ;;  %2514 = vst.msk [vmem:[%s4186_s20 + $0xe0] sm:$0xff] %vm2485_vm2, %v2448_v31  ;;  %v2451_v2 = vadd.f32 %v2450_v51, %v2266_v37 }
 0x311   : > { %2515 = vst.msk [vmem:[%s4186_s20 + $0xe8] sm:$0xff] %vm2485_vm2, %v2451_v2 }
 0x314   : > { %v2455_v54 = vpop.f32.mrb[156].mxu1 }
 0x315   : > { %v2985_v56 = vpop.f32.mrb[157].mxu1  ;;  %v2456_v7 = vadd.f32 %v2455_v54, %v2271_v40 }
 0x316   : > { %v2458_v57 = vpop.f32.mrb[158].mxu1 }
 0x317   : > { %v2986_v11 = vpop.f32.mrb[159].mxu1  ;;  %2516 = vst.msk [vmem:[%s4186_s20 + $0xf0] sm:$0xff] %vm2485_vm2, %v2456_v7  ;;  %v2459_v9 = vadd.f32 %v2458_v57, %v2274_v44 }
 0x319   : > { %2517 = vst.msk [vmem:[%s4186_s20 + $0xf8] sm:$0xff] %vm2485_vm2, %v2459_v9 }
 0x31c   : > { %v2463_v59 = vpop.f32.mrb[84].mxu1 }
 0x31d   : > { %2518 = vst.msk [vmem:[%s4186_s20 + $0x100] sm:$0xff] %vm2485_vm2, %v2463_v59  ;;  %v2989_v61 = vpop.f32.mrb[85].mxu1 }
 0x31e   : > { %v2466_v63 = vpop.f32.mrb[86].mxu1 }
 0x31f   : > { %2519 = vst.msk [vmem:[%s4186_s20 + $0x108] sm:$0xff] %vm2485_vm2, %v2466_v63  ;;  %v2990_v12 = vpop.f32.mrb[87].mxu1 }
 0x324   : > { %v2471_v17 = vpop.f32.mrb[88].mxu1 }
 0x325   : > { %2520 = vst.msk [vmem:[%s4186_s20 + $0x110] sm:$0xff] %vm2485_vm2, %v2471_v17  ;;  %v2993_v0 = vpop.f32.mrb[89].mxu1 }
 0x326   : > { %v2474_v5 = vpop.f32.mrb[90].mxu1 }
 0x327   : > { %2521 = vst.msk [vmem:[%s4186_s20 + $0x118] sm:$0xff] %vm2485_vm2, %v2474_v5  ;;  %v2994_v39 = vpop.f32.mrb[91].mxu1 }
 0x32c   : > { %v2479_v27 = vpop.f32.mrb[92].mxu1 }
 0x32d   : > { %2522 = vst.msk [vmem:[%s4186_s20 + $0x120] sm:$0xff] %vm2485_vm2, %v2479_v27  ;;  %v2997_v25 = vpop.f32.mrb[93].mxu1 }
 0x32e   : > { %v2482_v8 = vpop.f32.mrb[94].mxu1 }
 0x32f   : > { %v2998_v23 = vpop.f32.mrb[95].mxu1 }
 0x330 PF: > { %s15_s18 = sadd.s32 1, %s3275_s18  }
 0x331   : > { %p12_p4 = scmp.ge.s32.totalorder %s15_s18, 5  }
 0x333   :  { %14 = sbr.rel (!%p12_p4) target bundleno = 1 (0x1), region = 70 }

</bundles_post_ra>
